<compile_context>
chip_gen: v6e
topology: v6e:2x2x1
jax: 0.10.0
libtpu: 0.0.40
codegen_flags: <defaults>
</compile_context>

<pallas_src>
import functools

import jax
import jax.numpy as jnp
import numpy as np
from jax.experimental import pallas as pl
from jax.experimental.pallas import tpu as pltpu

# ----------------------------- config (small) --------------------------------
B = 2              # batch
OUT_CHANNELS = 8   # out_channels (mel channels) -> flow channels (n_sqz = 1)
T = 16             # time frames
HIDDEN_DEC = 16    # hidden_channels_dec
KERNEL_DEC = 5     # kernel_size_dec
DILATION_RATE = 2  # dilation_rate
N_BLOCKS_DEC = 2   # n_blocks_dec
N_BLOCK_LAYERS = 2 # n_block_layers
N_SPLIT = 4        # n_split
N_SQZ = 1          # n_sqz (default) -> squeeze/unsqueeze are no-ops
SIGMOID_SCALE = False

# maximum 'same' padding over all WN dilation levels
PADMAX = (DILATION_RATE ** (N_BLOCK_LAYERS - 1)) * (KERNEL_DEC - 1) // 2

# TODO(synk): gen=True / reverse path (inverse flows + torch.randn sampling),
#             the n_sqz>1 squeeze/unsqueeze path and ActNorm data-dependent
#             init (ddi) are not implemented (defaults: gen=False, n_sqz=1).


# ----------------------------- fused decoder kernel ---------------------------
def _decoder_kernel(coef_ref, x_ref, mask_ref, seg_ref,
                    an_bias_ref, an_logs_ref, inv_ref,
                    start_w_ref, start_b_ref,
                    in_w_ref, in_b_ref, rs_w_ref, rs_b_ref,
                    end_w_ref, end_b_ref,
                    z_ref, ld_ref, pad_ref,
                    *, n_blocks, n_layers, kernel_size, dilation_rate,
                    hidden, channels, padmax, lanes):
    """Whole FlowSpecDecoder forward on one lane-dense (C, lanes) slab."""
    K = kernel_size
    H = hidden
    L = lanes
    half = channels // 2

    x = x_ref[...]                          # (C, L) f32, zero at pad lanes
    mask = mask_ref[...]                    # (1, L) f32, zero at pad lanes
    ld_row = jnp.zeros((1, L), jnp.float32)

    # Zero the padded conv-input scratch once; only the centre region is ever
    # overwritten, so the PADMAX edge columns stay zero for every conv
    # (in-kernel zero padding).
    pad_ref[...] = jnp.zeros(pad_ref.shape, pad_ref.dtype)

    def mm(w_bf16, a_f32, b_f32):
        # bf16 MXU inputs, f32 accumulate; bias folded into the same kernel.
        return jnp.dot(w_bf16, a_f32.astype(jnp.bfloat16),
                       preferred_element_type=jnp.float32) + b_f32

    def dilated_conv(h, w_flat, bias, dil):
        # 'same' dilated conv as a single im2col matmul (K taps stacked).
        p = dil * (K - 1) // 2
        pad_ref[:, padmax:padmax + L] = h
        taps = [pad_ref[:, padmax + k * dil - p: padmax + k * dil - p + L]
                for k in range(K)]
        col = jnp.concatenate(taps, axis=0)           # (K*H, L)
        return mm(w_flat, col, bias)

    for blk in range(n_blocks):
        # ---- ActNorm ----
        x = (an_bias_ref[blk] + jnp.exp(an_logs_ref[blk]) * x) * mask
        # ---- InvConvNear: pre-expanded (C, C) channel-mixing matmul ----
        x = jnp.dot(inv_ref[blk], x.astype(jnp.bfloat16),
                    preferred_element_type=jnp.float32) * mask
        # ---- CouplingBlock ----
        x0 = x[:half]
        x1 = x[half:]
        h = mm(start_w_ref[blk], x0, start_b_ref[blk]) * mask
        skip = jnp.zeros((H, L), jnp.float32)
        for i in range(n_layers):
            dil = dilation_rate ** i
            x_in = dilated_conv(h, in_w_ref[blk, i], in_b_ref[blk, i], dil)
            acts = jnp.tanh(x_in[:H]) * jax.nn.sigmoid(x_in[H:])   # gated, g=0
            rs = mm(rs_w_ref[blk, i], acts, rs_b_ref[blk, i])
            if i < n_layers - 1:
                h = (h + rs[:H]) * mask
                skip = skip + rs[H:]
            else:
                skip = skip + rs[:H]                  # last layer: skip only
        out = mm(end_w_ref[blk], skip * mask, end_b_ref[blk])
        m = out[:half]
        logs = out[half:]                             # sigmoid_scale == False
        z1 = (m + jnp.exp(logs) * x1) * mask
        ld_row = ld_row + jnp.sum(logs * mask, axis=0, keepdims=True)
        x = jnp.concatenate([x0, z1], axis=0)

    z_ref[...] = x
    # per-batch logdet: coupling term + (sum(actnorm logs) + invconv slogdet *
    # C/n_split) coefficient (weight-only, precomputed) * valid length.
    seg = seg_ref[...]                                    # (B, L) one-hot rows
    x_len = jnp.sum(mask * seg, axis=1, keepdims=True)    # (B, 1)
    cpl = jnp.sum(ld_row * seg, axis=1, keepdims=True)    # (B, 1)
    ld_ref[...] = cpl + coef_ref[0] * x_len


# ----------------------------- forward wrapper --------------------------------
def flow_generator_forward(y, prep):
    """FlowGenerator.forward(y, gen=False) with the decoder fused in Pallas."""
    Bn, C, Tn = y.shape
    y_lengths = jnp.full((Bn,), Tn, dtype=jnp.int32)
    # preprocess (n_sqz == 1 -> squeeze/unsqueeze are identity)
    y_max_length = (Tn // N_SQZ) * N_SQZ
    y = y[:, :, :y_max_length]
    y_lengths = (y_lengths // N_SQZ) * N_SQZ
    Tm = y_max_length
    Tp = Tm + 2 * PADMAX
    L = Bn * Tp

    # lane-dense working layout: (C, B * Tp); each batch segment is zero-padded
    # by PADMAX on both sides (the in-kernel convs rely on those lanes being 0).
    xw = jnp.transpose(y, (1, 0, 2))                           # (C, B, Tm)
    xw = jnp.pad(xw, ((0, 0), (0, 0), (PADMAX, PADMAX)))       # (C, B, Tp)
    xw = xw.reshape(C, L)

    lane = jnp.arange(L, dtype=jnp.int32)
    q = lane % Tp
    bidx = lane // Tp
    # z_mask = sequence_mask(y_lengths, y_max_length), expressed in the padded
    # lane layout (zero at the per-batch pad lanes).
    valid = (q >= PADMAX) & ((q - PADMAX) < jnp.take(y_lengths, bidx))
    mask_row = valid.astype(jnp.float32)[None, :]              # (1, L)
    seg = (bidx[None, :] == jnp.arange(Bn)[:, None]).astype(jnp.float32)  # (B,L)

    kernel = functools.partial(
        _decoder_kernel, n_blocks=N_BLOCKS_DEC, n_layers=N_BLOCK_LAYERS,
        kernel_size=KERNEL_DEC, dilation_rate=DILATION_RATE,
        hidden=HIDDEN_DEC, channels=C, padmax=PADMAX, lanes=L)

    z_work, ld = pl.pallas_call(
        kernel,
        in_specs=[pl.BlockSpec(memory_space=pltpu.MemorySpace.SMEM)]
                + [pl.BlockSpec(memory_space=pltpu.MemorySpace.VMEM)] * 14,
        out_specs=(pl.BlockSpec(memory_space=pltpu.MemorySpace.VMEM),
                   pl.BlockSpec(memory_space=pltpu.MemorySpace.VMEM)),
        out_shape=(jax.ShapeDtypeStruct((C, L), jnp.float32),
                   jax.ShapeDtypeStruct((Bn, 1), jnp.float32)),
        scratch_shapes=[pltpu.VMEM((HIDDEN_DEC, L + 2 * PADMAX), jnp.float32)],
    )(prep["coef"], xw, mask_row, seg,
      prep["an_bias"], prep["an_logs"], prep["inv_m"],
      prep["start_w"], prep["start_b"],
      prep["in_w"], prep["in_b"], prep["rs_w"], prep["rs_b"],
      prep["end_w"], prep["end_b"])

    z = z_work.reshape(C, Bn, Tp)[:, :, PADMAX:PADMAX + Tm]
    z = jnp.transpose(z, (1, 0, 2))                            # (B, C, Tm)
    return z, ld[:, 0]


# ----------------------------- parameters -------------------------------------
def init_params(key):
    """Deterministic torch-layout parameters (same structure as the nn.Module)."""
    C = OUT_CHANNELS * N_SQZ
    H = HIDDEN_DEC
    K = KERNEL_DEC
    blocks = []
    for _ in range(N_BLOCKS_DEC):
        keys = jax.random.split(key, 8)
        key = keys[0]
        an_bias = 0.1 * jax.random.normal(keys[1], (1, C, 1), jnp.float32)
        an_logs = 0.1 * jax.random.normal(keys[2], (1, C, 1), jnp.float32)
        # InvConvNear: orthogonal init with positive determinant
        w0 = jax.random.normal(keys[3], (N_SPLIT, N_SPLIT), jnp.float32)
        qm, _ = jnp.linalg.qr(w0)
        qm = jnp.where(jnp.linalg.det(qm) < 0, qm.at[:, 0].multiply(-1.0), qm)
        start_w = 0.3 * jax.random.normal(keys[4], (H, C // 2, 1), jnp.float32)
        start_b = 0.05 * jax.random.normal(keys[5], (H,), jnp.float32)
        # (PyTorch zero-inits the end conv; small random used for a nontrivial test)
        end_w = 0.05 * jax.random.normal(keys[6], (C, H, 1), jnp.float32)
        end_b = jnp.zeros((C,), jnp.float32)
        wn = {"in_w": [], "in_b": [], "rs_w": [], "rs_b": []}
        wkey = keys[7]
        for i in range(N_BLOCK_LAYERS):
            wkeys = jax.random.split(wkey, 5)
            wkey = wkeys[0]
            wn["in_w"].append(
                jax.random.normal(wkeys[1], (2 * H, H, K), jnp.float32)
                / jnp.sqrt(H * K))
            wn["in_b"].append(0.05 * jax.random.normal(wkeys[2], (2 * H,),
                                                       jnp.float32))
            rs_ch = 2 * H if i < N_BLOCK_LAYERS - 1 else H
            wn["rs_w"].append(
                jax.random.normal(wkeys[3], (rs_ch, H, 1), jnp.float32)
                / jnp.sqrt(H))
            wn["rs_b"].append(0.05 * jax.random.normal(wkeys[4], (rs_ch,),
                                                       jnp.float32))
        blocks.append({
            "an_bias": an_bias, "an_logs": an_logs, "inv_w": qm,
            "cb": {"start_w": start_w, "start_b": start_b,
                   "end_w": end_w, "end_b": end_b, "wn": wn},
        })
    return {"blocks": blocks}


def _expand_invconv(w, channels, n_split):
    """Expand InvConvNear's (n_split, n_split) mixing into a (C, C) matrix so
    the view->permute->conv2d->permute->view chain becomes one matmul."""
    w = np.asarray(w, np.float32)
    half = n_split // 2
    m = np.zeros((channels, channels), np.float32)
    for cho in range(channels):
        ao, ro = divmod(cho, channels // 2)
        go, do = divmod(ro, half)
        so = ao * half + do
        for chi in range(channels):
            ai, ri = divmod(chi, channels // 2)
            gi, di = divmod(ri, half)
            si = ai * half + di
            if gi == go:
                m[cho, chi] = w[so, si]
    return m


def prepare_params(params):
    """One-time (at init, outside jit) repack: stack blocks, flatten conv taps
    to (Cout, K*Cin) im2col order, expand InvConvNear, precompute the
    weight-only logdet coefficient, and cast MXU-fed weights to bf16."""
    C = OUT_CHANNELS * N_SQZ
    H = HIDDEN_DEC
    K = KERNEL_DEC
    an_bias, an_logs, inv_m = [], [], []
    start_w, start_b, end_w, end_b = [], [], [], []
    in_w, in_b, rs_w, rs_b = [], [], [], []
    coef = 0.0
    for blk in params["blocks"]:
        ab = np.asarray(blk["an_bias"], np.float32).reshape(C, 1)
        al = np.asarray(blk["an_logs"], np.float32).reshape(C, 1)
        w_inv = np.asarray(blk["inv_w"], np.float32)
        # NOTE: torch.logdet assumes det > 0; init guarantees a positive det.
        _, logabsdet = np.linalg.slogdet(w_inv)
        coef += float(al.sum()) + float(logabsdet) * (C / N_SPLIT)
        an_bias.append(ab)
        an_logs.append(al)
        inv_m.append(_expand_invconv(w_inv, C, N_SPLIT))
        cb = blk["cb"]
        start_w.append(np.asarray(cb["start_w"], np.float32)[:, :, 0])
        start_b.append(np.asarray(cb["start_b"], np.float32)[:, None])
        end_w.append(np.asarray(cb["end_w"], np.float32)[:, :, 0])
        end_b.append(np.asarray(cb["end_b"], np.float32)[:, None])
        iw, ib, rw, rb = [], [], [], []
        for i in range(N_BLOCK_LAYERS):
            w = np.asarray(cb["wn"]["in_w"][i], np.float32)      # (2H, H, K)
            iw.append(np.transpose(w, (0, 2, 1)).reshape(2 * H, K * H))
            ib.append(np.asarray(cb["wn"]["in_b"][i], np.float32)[:, None])
            r = np.asarray(cb["wn"]["rs_w"][i], np.float32)[:, :, 0]
            rbi = np.asarray(cb["wn"]["rs_b"][i], np.float32)[:, None]
            if r.shape[0] < 2 * H:   # last layer: pad skip-only conv to 2H rows
                r = np.concatenate(
                    [r, np.zeros((2 * H - r.shape[0], H), np.float32)], axis=0)
                rbi = np.concatenate(
                    [rbi, np.zeros((2 * H - rbi.shape[0], 1), np.float32)],
                    axis=0)
            rw.append(r)
            rb.append(rbi)
        in_w.append(np.stack(iw))
        in_b.append(np.stack(ib))
        rs_w.append(np.stack(rw))
        rs_b.append(np.stack(rb))

    def f32(x):
        return jnp.asarray(np.stack(x), jnp.float32)

    def bf16(x):
        return jnp.asarray(np.stack(x), jnp.float32).astype(jnp.bfloat16)

    return {
        "coef": jnp.asarray([coef], jnp.float32),
        "an_bias": f32(an_bias), "an_logs": f32(an_logs),
        "inv_m": bf16(inv_m),
        "start_w": bf16(start_w), "start_b": f32(start_b),
        "in_w": bf16(in_w), "in_b": f32(in_b),
        "rs_w": bf16(rs_w), "rs_b": f32(rs_b),
        "end_w": bf16(end_w), "end_b": f32(end_b),
    }


# ----------------------------- main -------------------------------------------
if __name__ == "__main__":
    root = jax.random.PRNGKey(0)
    k_param, k_data = jax.random.split(root)
    params = init_params(k_param)
    prep = prepare_params(params)      # one-time weight repack (hoisted out of fwd)
    y = jax.random.normal(k_data, (B, OUT_CHANNELS, T), jnp.float32)

    fwd = jax.jit(flow_generator_forward)
    z, logdet = fwd(y, prep)
    z = jax.block_until_ready(z)
    logdet = jax.block_until_ready(logdet)

    assert z.shape == (B, OUT_CHANNELS, T), z.shape
    assert logdet.shape == (B,), logdet.shape
    assert bool(jnp.all(jnp.isfinite(z))) and bool(jnp.all(jnp.isfinite(logdet)))
    print("KERNEL_OK")
</pallas_src>

<mosaic_0001>
module attributes {stable_mosaic.version = 11 : i64} {
  func.func @_decoder_kernel(%arg0: memref<1xf32, #tpu.memory_space<smem>>, %arg1: memref<8x48xf32, #tpu.memory_space<vmem>>, %arg2: memref<1x48xf32, #tpu.memory_space<vmem>>, %arg3: memref<2x48xf32, #tpu.memory_space<vmem>>, %arg4: memref<2x8x1xf32, #tpu.memory_space<vmem>>, %arg5: memref<2x8x1xf32, #tpu.memory_space<vmem>>, %arg6: memref<2x8x8xbf16, #tpu.memory_space<vmem>>, %arg7: memref<2x16x4xbf16, #tpu.memory_space<vmem>>, %arg8: memref<2x16x1xf32, #tpu.memory_space<vmem>>, %arg9: memref<2x2x32x80xbf16, #tpu.memory_space<vmem>>, %arg10: memref<2x2x32x1xf32, #tpu.memory_space<vmem>>, %arg11: memref<2x2x32x16xbf16, #tpu.memory_space<vmem>>, %arg12: memref<2x2x32x1xf32, #tpu.memory_space<vmem>>, %arg13: memref<2x8x16xbf16, #tpu.memory_space<vmem>>, %arg14: memref<2x8x1xf32, #tpu.memory_space<vmem>>, %arg15: memref<8x48xf32, #tpu.memory_space<vmem>>, %arg16: memref<2x1xf32, #tpu.memory_space<vmem>>, %arg17: memref<16x56xf32, #tpu.memory_space<vmem>>) attributes {dimension_semantics = [], scalar_prefetch = 0 : i64, scratch_operands = 1 : i64, tpu.core_type = #tpu.core_type<tc>} {
    %c0 = arith.constant 0 : index
    %c0_0 = arith.constant 0 : index
    %0 = vector.load %arg1[%c0, %c0_0] : memref<8x48xf32, #tpu.memory_space<vmem>>, vector<8x48xf32>
    %c0_1 = arith.constant 0 : index
    %c0_2 = arith.constant 0 : index
    %1 = vector.load %arg2[%c0_1, %c0_2] : memref<1x48xf32, #tpu.memory_space<vmem>>, vector<1x48xf32>
    %cst = arith.constant 0.000000e+00 : f32
    %2 = vector.broadcast %cst : f32 to vector<1x48xf32>
    %cst_3 = arith.constant 0.000000e+00 : f32
    %3 = vector.broadcast %cst_3 : f32 to vector<16x56xf32>
    %c0_4 = arith.constant 0 : index
    %c0_5 = arith.constant 0 : index
    %4 = vector.load %arg17[%c0_4, %c0_5] : memref<16x56xf32, #tpu.memory_space<vmem>>, vector<16x56xf32>
    tpu.vector_store %arg17[%c0_4, %c0_5], %3 {strides = array<i32>} : memref<16x56xf32, #tpu.memory_space<vmem>>, vector<16x56xf32>,
    %c0_6 = arith.constant 0 : index
    %c0_7 = arith.constant 0 : index
    %c0_8 = arith.constant 0 : index
    %5 = vector.load %arg4[%c0_6, %c0_7, %c0_8] : memref<2x8x1xf32, #tpu.memory_space<vmem>>, vector<1x8x1xf32>
    %6 = vector.shape_cast %5 : vector<1x8x1xf32> to vector<8x1xf32>
    %c0_9 = arith.constant 0 : index
    %c0_10 = arith.constant 0 : index
    %c0_11 = arith.constant 0 : index
    %7 = vector.load %arg5[%c0_9, %c0_10, %c0_11] : memref<2x8x1xf32, #tpu.memory_space<vmem>>, vector<1x8x1xf32>
    %8 = vector.shape_cast %7 : vector<1x8x1xf32> to vector<8x1xf32>
    %9 = math.exp %8 : vector<8x1xf32>
    %10 = vector.broadcast %9 : vector<8x1xf32> to vector<8x48xf32>
    %11 = arith.mulf %10, %0 : vector<8x48xf32>
    %12 = vector.broadcast %6 : vector<8x1xf32> to vector<8x48xf32>
    %13 = arith.addf %12, %11 : vector<8x48xf32>
    %14 = vector.broadcast %1 : vector<1x48xf32> to vector<8x48xf32>
    %15 = arith.mulf %13, %14 : vector<8x48xf32>
    %c0_12 = arith.constant 0 : index
    %c0_13 = arith.constant 0 : index
    %c0_14 = arith.constant 0 : index
    %16 = vector.load %arg6[%c0_12, %c0_13, %c0_14] : memref<2x8x8xbf16, #tpu.memory_space<vmem>>, vector<1x8x8xbf16>
    %17 = vector.shape_cast %16 : vector<1x8x8xbf16> to vector<8x8xbf16>
    %18 = arith.truncf %15 : vector<8x48xf32> to vector<8x48xbf16>
    %cst_15 = arith.constant dense<0.000000e+00> : vector<8x48xf32>
    %19 = tpu.matmul %17, %18, %cst_15 {dimension_numbers = #tpu.dot_dimension_numbers<[1], [0], [0], [1], [0, 0, 1, 1], [], []>} : vector<8x8xbf16>, vector<8x48xbf16>, vector<8x48xf32> -> vector<8x48xf32>
    %20 = vector.broadcast %1 : vector<1x48xf32> to vector<8x48xf32>
    %21 = arith.mulf %19, %20 : vector<8x48xf32>
    %22 = vector.extract_strided_slice %21 {offsets = [0, 0], sizes = [4, 48], strides = [1, 1]} : vector<8x48xf32> to vector<4x48xf32>
    %23 = vector.extract_strided_slice %21 {offsets = [4, 0], sizes = [4, 48], strides = [1, 1]} : vector<8x48xf32> to vector<4x48xf32>
    %c0_16 = arith.constant 0 : index
    %c0_17 = arith.constant 0 : index
    %c0_18 = arith.constant 0 : index
    %24 = vector.load %arg7[%c0_16, %c0_17, %c0_18] : memref<2x16x4xbf16, #tpu.memory_space<vmem>>, vector<1x16x4xbf16>
    %25 = vector.shape_cast %24 : vector<1x16x4xbf16> to vector<16x4xbf16>
    %c0_19 = arith.constant 0 : index
    %c0_20 = arith.constant 0 : index
    %c0_21 = arith.constant 0 : index
    %26 = vector.load %arg8[%c0_19, %c0_20, %c0_21] : memref<2x16x1xf32, #tpu.memory_space<vmem>>, vector<1x16x1xf32>
    %27 = vector.shape_cast %26 : vector<1x16x1xf32> to vector<16x1xf32>
    %28 = arith.truncf %22 : vector<4x48xf32> to vector<4x48xbf16>
    %cst_22 = arith.constant dense<0.000000e+00> : vector<16x48xf32>
    %29 = tpu.matmul %25, %28, %cst_22 {dimension_numbers = #tpu.dot_dimension_numbers<[1], [0], [0], [1], [0, 0, 1, 1], [], []>} : vector<16x4xbf16>, vector<4x48xbf16>, vector<16x48xf32> -> vector<16x48xf32>
    %30 = vector.broadcast %27 : vector<16x1xf32> to vector<16x48xf32>
    %31 = arith.addf %29, %30 : vector<16x48xf32>
    %32 = vector.broadcast %1 : vector<1x48xf32> to vector<16x48xf32>
    %33 = arith.mulf %31, %32 : vector<16x48xf32>
    %cst_23 = arith.constant 0.000000e+00 : f32
    %34 = vector.broadcast %cst_23 : f32 to vector<16x48xf32>
    %c0_24 = arith.constant 0 : index
    %c0_25 = arith.constant 0 : index
    %c0_26 = arith.constant 0 : index
    %c0_27 = arith.constant 0 : index
    %35 = vector.load %arg9[%c0_24, %c0_25, %c0_26, %c0_27] : memref<2x2x32x80xbf16, #tpu.memory_space<vmem>>, vector<1x1x32x80xbf16>
    %36 = vector.shape_cast %35 : vector<1x1x32x80xbf16> to vector<32x80xbf16>
    %c0_28 = arith.constant 0 : index
    %c0_29 = arith.constant 0 : index
    %c0_30 = arith.constant 0 : index
    %c0_31 = arith.constant 0 : index
    %37 = vector.load %arg10[%c0_28, %c0_29, %c0_30, %c0_31] : memref<2x2x32x1xf32, #tpu.memory_space<vmem>>, vector<1x1x32x1xf32>
    %38 = vector.shape_cast %37 : vector<1x1x32x1xf32> to vector<32x1xf32>
    %c0_32 = arith.constant 0 : index
    %c4 = arith.constant 4 : index
    %39 = vector.load %arg17[%c0_32, %c4] : memref<16x56xf32, #tpu.memory_space<vmem>>, vector<16x48xf32>
    tpu.vector_store %arg17[%c0_32, %c4], %33 {strides = array<i32>} : memref<16x56xf32, #tpu.memory_space<vmem>>, vector<16x48xf32>,
    %c0_33 = arith.constant 0 : index
    %c2 = arith.constant 2 : index
    %40 = vector.load %arg17[%c0_33, %c2] : memref<16x56xf32, #tpu.memory_space<vmem>>, vector<16x48xf32>
    %c0_34 = arith.constant 0 : index
    %c3 = arith.constant 3 : index
    %41 = vector.load %arg17[%c0_34, %c3] : memref<16x56xf32, #tpu.memory_space<vmem>>, vector<16x48xf32>
    %c0_35 = arith.constant 0 : index
    %c4_36 = arith.constant 4 : index
    %42 = vector.load %arg17[%c0_35, %c4_36] : memref<16x56xf32, #tpu.memory_space<vmem>>, vector<16x48xf32>
    %c0_37 = arith.constant 0 : index
    %c5 = arith.constant 5 : index
    %43 = vector.load %arg17[%c0_37, %c5] : memref<16x56xf32, #tpu.memory_space<vmem>>, vector<16x48xf32>
    %c0_38 = arith.constant 0 : index
    %c6 = arith.constant 6 : index
    %44 = vector.load %arg17[%c0_38, %c6] : memref<16x56xf32, #tpu.memory_space<vmem>>, vector<16x48xf32>
    %45 = tpu.concatenate %40, %41, %42, %43, %44 in 0 : vector<16x48xf32>, vector<16x48xf32>, vector<16x48xf32>, vector<16x48xf32>, vector<16x48xf32> -> vector<80x48xf32>
    %46 = arith.truncf %45 : vector<80x48xf32> to vector<80x48xbf16>
    %cst_39 = arith.constant dense<0.000000e+00> : vector<32x48xf32>
    %47 = tpu.matmul %36, %46, %cst_39 {dimension_numbers = #tpu.dot_dimension_numbers<[1], [0], [0], [1], [0, 0, 1, 1], [], []>} : vector<32x80xbf16>, vector<80x48xbf16>, vector<32x48xf32> -> vector<32x48xf32>
    %48 = vector.broadcast %38 : vector<32x1xf32> to vector<32x48xf32>
    %49 = arith.addf %47, %48 : vector<32x48xf32>
    %50 = vector.extract_strided_slice %49 {offsets = [0, 0], sizes = [16, 48], strides = [1, 1]} : vector<32x48xf32> to vector<16x48xf32>
    %51 = math.tanh %50 : vector<16x48xf32>
    %52 = vector.extract_strided_slice %49 {offsets = [16, 0], sizes = [16, 48], strides = [1, 1]} : vector<32x48xf32> to vector<16x48xf32>
    %53 = arith.negf %52 : vector<16x48xf32>
    %54 = math.exp %53 : vector<16x48xf32>
    %cst_40 = arith.constant 1.000000e+00 : f32
    %55 = vector.broadcast %cst_40 : f32 to vector<16x48xf32>
    %56 = arith.addf %55, %54 : vector<16x48xf32>
    %57 = arith.divf %55, %56 : vector<16x48xf32>
    %58 = arith.mulf %51, %57 : vector<16x48xf32>
    %c0_41 = arith.constant 0 : index
    %c0_42 = arith.constant 0 : index
    %c0_43 = arith.constant 0 : index
    %c0_44 = arith.constant 0 : index
    %59 = vector.load %arg11[%c0_41, %c0_42, %c0_43, %c0_44] : memref<2x2x32x16xbf16, #tpu.memory_space<vmem>>, vector<1x1x32x16xbf16>
    %60 = vector.shape_cast %59 : vector<1x1x32x16xbf16> to vector<32x16xbf16>
    %c0_45 = arith.constant 0 : index
    %c0_46 = arith.constant 0 : index
    %c0_47 = arith.constant 0 : index
    %c0_48 = arith.constant 0 : index
    %61 = vector.load %arg12[%c0_45, %c0_46, %c0_47, %c0_48] : memref<2x2x32x1xf32, #tpu.memory_space<vmem>>, vector<1x1x32x1xf32>
    %62 = vector.shape_cast %61 : vector<1x1x32x1xf32> to vector<32x1xf32>
    %63 = arith.truncf %58 : vector<16x48xf32> to vector<16x48xbf16>
    %cst_49 = arith.constant dense<0.000000e+00> : vector<32x48xf32>
    %64 = tpu.matmul %60, %63, %cst_49 {dimension_numbers = #tpu.dot_dimension_numbers<[1], [0], [0], [1], [0, 0, 1, 1], [], []>} : vector<32x16xbf16>, vector<16x48xbf16>, vector<32x48xf32> -> vector<32x48xf32>
    %65 = vector.broadcast %62 : vector<32x1xf32> to vector<32x48xf32>
    %66 = arith.addf %64, %65 : vector<32x48xf32>
    %67 = vector.extract_strided_slice %66 {offsets = [0, 0], sizes = [16, 48], strides = [1, 1]} : vector<32x48xf32> to vector<16x48xf32>
    %68 = arith.addf %33, %67 : vector<16x48xf32>
    %69 = vector.broadcast %1 : vector<1x48xf32> to vector<16x48xf32>
    %70 = arith.mulf %68, %69 : vector<16x48xf32>
    %71 = vector.extract_strided_slice %66 {offsets = [16, 0], sizes = [16, 48], strides = [1, 1]} : vector<32x48xf32> to vector<16x48xf32>
    %72 = arith.addf %34, %71 : vector<16x48xf32>
    %c0_50 = arith.constant 0 : index
    %c1 = arith.constant 1 : index
    %c0_51 = arith.constant 0 : index
    %c0_52 = arith.constant 0 : index
    %73 = vector.load %arg9[%c0_50, %c1, %c0_51, %c0_52] : memref<2x2x32x80xbf16, #tpu.memory_space<vmem>>, vector<1x1x32x80xbf16>
    %74 = vector.shape_cast %73 : vector<1x1x32x80xbf16> to vector<32x80xbf16>
    %c0_53 = arith.constant 0 : index
    %c1_54 = arith.constant 1 : index
    %c0_55 = arith.constant 0 : index
    %c0_56 = arith.constant 0 : index
    %75 = vector.load %arg10[%c0_53, %c1_54, %c0_55, %c0_56] : memref<2x2x32x1xf32, #tpu.memory_space<vmem>>, vector<1x1x32x1xf32>
    %76 = vector.shape_cast %75 : vector<1x1x32x1xf32> to vector<32x1xf32>
    %c0_57 = arith.constant 0 : index
    %c4_58 = arith.constant 4 : index
    %77 = vector.load %arg17[%c0_57, %c4_58] : memref<16x56xf32, #tpu.memory_space<vmem>>, vector<16x48xf32>
    tpu.vector_store %arg17[%c0_57, %c4_58], %70 {strides = array<i32>} : memref<16x56xf32, #tpu.memory_space<vmem>>, vector<16x48xf32>,
    %c0_59 = arith.constant 0 : index
    %c0_60 = arith.constant 0 : index
    %78 = vector.load %arg17[%c0_59, %c0_60] : memref<16x56xf32, #tpu.memory_space<vmem>>, vector<16x48xf32>
    %c0_61 = arith.constant 0 : index
    %c2_62 = arith.constant 2 : index
    %79 = vector.load %arg17[%c0_61, %c2_62] : memref<16x56xf32, #tpu.memory_space<vmem>>, vector<16x48xf32>
    %c0_63 = arith.constant 0 : index
    %c4_64 = arith.constant 4 : index
    %80 = vector.load %arg17[%c0_63, %c4_64] : memref<16x56xf32, #tpu.memory_space<vmem>>, vector<16x48xf32>
    %c0_65 = arith.constant 0 : index
    %c6_66 = arith.constant 6 : index
    %81 = vector.load %arg17[%c0_65, %c6_66] : memref<16x56xf32, #tpu.memory_space<vmem>>, vector<16x48xf32>
    %c0_67 = arith.constant 0 : index
    %c8 = arith.constant 8 : index
    %82 = vector.load %arg17[%c0_67, %c8] : memref<16x56xf32, #tpu.memory_space<vmem>>, vector<16x48xf32>
    %83 = tpu.concatenate %78, %79, %80, %81, %82 in 0 : vector<16x48xf32>, vector<16x48xf32>, vector<16x48xf32>, vector<16x48xf32>, vector<16x48xf32> -> vector<80x48xf32>
    %84 = arith.truncf %83 : vector<80x48xf32> to vector<80x48xbf16>
    %cst_68 = arith.constant dense<0.000000e+00> : vector<32x48xf32>
    %85 = tpu.matmul %74, %84, %cst_68 {dimension_numbers = #tpu.dot_dimension_numbers<[1], [0], [0], [1], [0, 0, 1, 1], [], []>} : vector<32x80xbf16>, vector<80x48xbf16>, vector<32x48xf32> -> vector<32x48xf32>
    %86 = vector.broadcast %76 : vector<32x1xf32> to vector<32x48xf32>
    %87 = arith.addf %85, %86 : vector<32x48xf32>
    %88 = vector.extract_strided_slice %87 {offsets = [0, 0], sizes = [16, 48], strides = [1, 1]} : vector<32x48xf32> to vector<16x48xf32>
    %89 = math.tanh %88 : vector<16x48xf32>
    %90 = vector.extract_strided_slice %87 {offsets = [16, 0], sizes = [16, 48], strides = [1, 1]} : vector<32x48xf32> to vector<16x48xf32>
    %91 = arith.negf %90 : vector<16x48xf32>
    %92 = math.exp %91 : vector<16x48xf32>
    %cst_69 = arith.constant 1.000000e+00 : f32
    %93 = vector.broadcast %cst_69 : f32 to vector<16x48xf32>
    %94 = arith.addf %93, %92 : vector<16x48xf32>
    %95 = arith.divf %93, %94 : vector<16x48xf32>
    %96 = arith.mulf %89, %95 : vector<16x48xf32>
    %c0_70 = arith.constant 0 : index
    %c1_71 = arith.constant 1 : index
    %c0_72 = arith.constant 0 : index
    %c0_73 = arith.constant 0 : index
    %97 = vector.load %arg11[%c0_70, %c1_71, %c0_72, %c0_73] : memref<2x2x32x16xbf16, #tpu.memory_space<vmem>>, vector<1x1x32x16xbf16>
    %98 = vector.shape_cast %97 : vector<1x1x32x16xbf16> to vector<32x16xbf16>
    %c0_74 = arith.constant 0 : index
    %c1_75 = arith.constant 1 : index
    %c0_76 = arith.constant 0 : index
    %c0_77 = arith.constant 0 : index
    %99 = vector.load %arg12[%c0_74, %c1_75, %c0_76, %c0_77] : memref<2x2x32x1xf32, #tpu.memory_space<vmem>>, vector<1x1x32x1xf32>
    %100 = vector.shape_cast %99 : vector<1x1x32x1xf32> to vector<32x1xf32>
    %101 = arith.truncf %96 : vector<16x48xf32> to vector<16x48xbf16>
    %cst_78 = arith.constant dense<0.000000e+00> : vector<32x48xf32>
    %102 = tpu.matmul %98, %101, %cst_78 {dimension_numbers = #tpu.dot_dimension_numbers<[1], [0], [0], [1], [0, 0, 1, 1], [], []>} : vector<32x16xbf16>, vector<16x48xbf16>, vector<32x48xf32> -> vector<32x48xf32>
    %103 = vector.broadcast %100 : vector<32x1xf32> to vector<32x48xf32>
    %104 = arith.addf %102, %103 : vector<32x48xf32>
    %105 = vector.extract_strided_slice %104 {offsets = [0, 0], sizes = [16, 48], strides = [1, 1]} : vector<32x48xf32> to vector<16x48xf32>
    %106 = arith.addf %72, %105 : vector<16x48xf32>
    %c0_79 = arith.constant 0 : index
    %c0_80 = arith.constant 0 : index
    %c0_81 = arith.constant 0 : index
    %107 = vector.load %arg13[%c0_79, %c0_80, %c0_81] : memref<2x8x16xbf16, #tpu.memory_space<vmem>>, vector<1x8x16xbf16>
    %108 = vector.shape_cast %107 : vector<1x8x16xbf16> to vector<8x16xbf16>
    %109 = vector.broadcast %1 : vector<1x48xf32> to vector<16x48xf32>
    %110 = arith.mulf %106, %109 : vector<16x48xf32>
    %c0_82 = arith.constant 0 : index
    %c0_83 = arith.constant 0 : index
    %c0_84 = arith.constant 0 : index
    %111 = vector.load %arg14[%c0_82, %c0_83, %c0_84] : memref<2x8x1xf32, #tpu.memory_space<vmem>>, vector<1x8x1xf32>
    %112 = vector.shape_cast %111 : vector<1x8x1xf32> to vector<8x1xf32>
    %113 = arith.truncf %110 : vector<16x48xf32> to vector<16x48xbf16>
    %cst_85 = arith.constant dense<0.000000e+00> : vector<8x48xf32>
    %114 = tpu.matmul %108, %113, %cst_85 {dimension_numbers = #tpu.dot_dimension_numbers<[1], [0], [0], [1], [0, 0, 1, 1], [], []>} : vector<8x16xbf16>, vector<16x48xbf16>, vector<8x48xf32> -> vector<8x48xf32>
    %115 = vector.broadcast %112 : vector<8x1xf32> to vector<8x48xf32>
    %116 = arith.addf %114, %115 : vector<8x48xf32>
    %117 = vector.extract_strided_slice %116 {offsets = [0, 0], sizes = [4, 48], strides = [1, 1]} : vector<8x48xf32> to vector<4x48xf32>
    %118 = vector.extract_strided_slice %116 {offsets = [4, 0], sizes = [4, 48], strides = [1, 1]} : vector<8x48xf32> to vector<4x48xf32>
    %119 = math.exp %118 : vector<4x48xf32>
    %120 = arith.mulf %119, %23 : vector<4x48xf32>
    %121 = arith.addf %117, %120 : vector<4x48xf32>
    %122 = vector.broadcast %1 : vector<1x48xf32> to vector<4x48xf32>
    %123 = arith.mulf %121, %122 : vector<4x48xf32>
    %124 = vector.broadcast %1 : vector<1x48xf32> to vector<4x48xf32>
    %125 = arith.mulf %118, %124 : vector<4x48xf32>
    %cst_86 = arith.constant dense<0.000000e+00> : vector<48xf32>
    %126 = vector.multi_reduction <add>, %125, %cst_86 [0] : vector<4x48xf32> to vector<48xf32>
    %127 = vector.shape_cast %126 : vector<48xf32> to vector<1x48xf32>
    %128 = arith.addf %2, %127 : vector<1x48xf32>
    %129 = tpu.concatenate %22, %123 in 0 : vector<4x48xf32>, vector<4x48xf32> -> vector<8x48xf32>
    %c1_87 = arith.constant 1 : index
    %c0_88 = arith.constant 0 : index
    %c0_89 = arith.constant 0 : index
    %130 = vector.load %arg4[%c1_87, %c0_88, %c0_89] : memref<2x8x1xf32, #tpu.memory_space<vmem>>, vector<1x8x1xf32>
    %131 = vector.shape_cast %130 : vector<1x8x1xf32> to vector<8x1xf32>
    %c1_90 = arith.constant 1 : index
    %c0_91 = arith.constant 0 : index
    %c0_92 = arith.constant 0 : index
    %132 = vector.load %arg5[%c1_90, %c0_91, %c0_92] : memref<2x8x1xf32, #tpu.memory_space<vmem>>, vector<1x8x1xf32>
    %133 = vector.shape_cast %132 : vector<1x8x1xf32> to vector<8x1xf32>
    %134 = math.exp %133 : vector<8x1xf32>
    %135 = vector.broadcast %134 : vector<8x1xf32> to vector<8x48xf32>
    %136 = arith.mulf %135, %129 : vector<8x48xf32>
    %137 = vector.broadcast %131 : vector<8x1xf32> to vector<8x48xf32>
    %138 = arith.addf %137, %136 : vector<8x48xf32>
    %139 = vector.broadcast %1 : vector<1x48xf32> to vector<8x48xf32>
    %140 = arith.mulf %138, %139 : vector<8x48xf32>
    %c1_93 = arith.constant 1 : index
    %c0_94 = arith.constant 0 : index
    %c0_95 = arith.constant 0 : index
    %141 = vector.load %arg6[%c1_93, %c0_94, %c0_95] : memref<2x8x8xbf16, #tpu.memory_space<vmem>>, vector<1x8x8xbf16>
    %142 = vector.shape_cast %141 : vector<1x8x8xbf16> to vector<8x8xbf16>
    %143 = arith.truncf %140 : vector<8x48xf32> to vector<8x48xbf16>
    %cst_96 = arith.constant dense<0.000000e+00> : vector<8x48xf32>
    %144 = tpu.matmul %142, %143, %cst_96 {dimension_numbers = #tpu.dot_dimension_numbers<[1], [0], [0], [1], [0, 0, 1, 1], [], []>} : vector<8x8xbf16>, vector<8x48xbf16>, vector<8x48xf32> -> vector<8x48xf32>
    %145 = vector.broadcast %1 : vector<1x48xf32> to vector<8x48xf32>
    %146 = arith.mulf %144, %145 : vector<8x48xf32>
    %147 = vector.extract_strided_slice %146 {offsets = [0, 0], sizes = [4, 48], strides = [1, 1]} : vector<8x48xf32> to vector<4x48xf32>
    %148 = vector.extract_strided_slice %146 {offsets = [4, 0], sizes = [4, 48], strides = [1, 1]} : vector<8x48xf32> to vector<4x48xf32>
    %c1_97 = arith.constant 1 : index
    %c0_98 = arith.constant 0 : index
    %c0_99 = arith.constant 0 : index
    %149 = vector.load %arg7[%c1_97, %c0_98, %c0_99] : memref<2x16x4xbf16, #tpu.memory_space<vmem>>, vector<1x16x4xbf16>
    %150 = vector.shape_cast %149 : vector<1x16x4xbf16> to vector<16x4xbf16>
    %c1_100 = arith.constant 1 : index
    %c0_101 = arith.constant 0 : index
    %c0_102 = arith.constant 0 : index
    %151 = vector.load %arg8[%c1_100, %c0_101, %c0_102] : memref<2x16x1xf32, #tpu.memory_space<vmem>>, vector<1x16x1xf32>
    %152 = vector.shape_cast %151 : vector<1x16x1xf32> to vector<16x1xf32>
    %153 = arith.truncf %147 : vector<4x48xf32> to vector<4x48xbf16>
    %cst_103 = arith.constant dense<0.000000e+00> : vector<16x48xf32>
    %154 = tpu.matmul %150, %153, %cst_103 {dimension_numbers = #tpu.dot_dimension_numbers<[1], [0], [0], [1], [0, 0, 1, 1], [], []>} : vector<16x4xbf16>, vector<4x48xbf16>, vector<16x48xf32> -> vector<16x48xf32>
    %155 = vector.broadcast %152 : vector<16x1xf32> to vector<16x48xf32>
    %156 = arith.addf %154, %155 : vector<16x48xf32>
    %157 = vector.broadcast %1 : vector<1x48xf32> to vector<16x48xf32>
    %158 = arith.mulf %156, %157 : vector<16x48xf32>
    %cst_104 = arith.constant 0.000000e+00 : f32
    %159 = vector.broadcast %cst_104 : f32 to vector<16x48xf32>
    %c1_105 = arith.constant 1 : index
    %c0_106 = arith.constant 0 : index
    %c0_107 = arith.constant 0 : index
    %c0_108 = arith.constant 0 : index
    %160 = vector.load %arg9[%c1_105, %c0_106, %c0_107, %c0_108] : memref<2x2x32x80xbf16, #tpu.memory_space<vmem>>, vector<1x1x32x80xbf16>
    %161 = vector.shape_cast %160 : vector<1x1x32x80xbf16> to vector<32x80xbf16>
    %c1_109 = arith.constant 1 : index
    %c0_110 = arith.constant 0 : index
    %c0_111 = arith.constant 0 : index
    %c0_112 = arith.constant 0 : index
    %162 = vector.load %arg10[%c1_109, %c0_110, %c0_111, %c0_112] : memref<2x2x32x1xf32, #tpu.memory_space<vmem>>, vector<1x1x32x1xf32>
    %163 = vector.shape_cast %162 : vector<1x1x32x1xf32> to vector<32x1xf32>
    %c0_113 = arith.constant 0 : index
    %c4_114 = arith.constant 4 : index
    %164 = vector.load %arg17[%c0_113, %c4_114] : memref<16x56xf32, #tpu.memory_space<vmem>>, vector<16x48xf32>
    tpu.vector_store %arg17[%c0_113, %c4_114], %158 {strides = array<i32>} : memref<16x56xf32, #tpu.memory_space<vmem>>, vector<16x48xf32>,
    %c0_115 = arith.constant 0 : index
    %c2_116 = arith.constant 2 : index
    %165 = vector.load %arg17[%c0_115, %c2_116] : memref<16x56xf32, #tpu.memory_space<vmem>>, vector<16x48xf32>
    %c0_117 = arith.constant 0 : index
    %c3_118 = arith.constant 3 : index
    %166 = vector.load %arg17[%c0_117, %c3_118] : memref<16x56xf32, #tpu.memory_space<vmem>>, vector<16x48xf32>
    %c0_119 = arith.constant 0 : index
    %c4_120 = arith.constant 4 : index
    %167 = vector.load %arg17[%c0_119, %c4_120] : memref<16x56xf32, #tpu.memory_space<vmem>>, vector<16x48xf32>
    %c0_121 = arith.constant 0 : index
    %c5_122 = arith.constant 5 : index
    %168 = vector.load %arg17[%c0_121, %c5_122] : memref<16x56xf32, #tpu.memory_space<vmem>>, vector<16x48xf32>
    %c0_123 = arith.constant 0 : index
    %c6_124 = arith.constant 6 : index
    %169 = vector.load %arg17[%c0_123, %c6_124] : memref<16x56xf32, #tpu.memory_space<vmem>>, vector<16x48xf32>
    %170 = tpu.concatenate %165, %166, %167, %168, %169 in 0 : vector<16x48xf32>, vector<16x48xf32>, vector<16x48xf32>, vector<16x48xf32>, vector<16x48xf32> -> vector<80x48xf32>
    %171 = arith.truncf %170 : vector<80x48xf32> to vector<80x48xbf16>
    %cst_125 = arith.constant dense<0.000000e+00> : vector<32x48xf32>
    %172 = tpu.matmul %161, %171, %cst_125 {dimension_numbers = #tpu.dot_dimension_numbers<[1], [0], [0], [1], [0, 0, 1, 1], [], []>} : vector<32x80xbf16>, vector<80x48xbf16>, vector<32x48xf32> -> vector<32x48xf32>
    %173 = vector.broadcast %163 : vector<32x1xf32> to vector<32x48xf32>
    %174 = arith.addf %172, %173 : vector<32x48xf32>
    %175 = vector.extract_strided_slice %174 {offsets = [0, 0], sizes = [16, 48], strides = [1, 1]} : vector<32x48xf32> to vector<16x48xf32>
    %176 = math.tanh %175 : vector<16x48xf32>
    %177 = vector.extract_strided_slice %174 {offsets = [16, 0], sizes = [16, 48], strides = [1, 1]} : vector<32x48xf32> to vector<16x48xf32>
    %178 = arith.negf %177 : vector<16x48xf32>
    %179 = math.exp %178 : vector<16x48xf32>
    %cst_126 = arith.constant 1.000000e+00 : f32
    %180 = vector.broadcast %cst_126 : f32 to vector<16x48xf32>
    %181 = arith.addf %180, %179 : vector<16x48xf32>
    %182 = arith.divf %180, %181 : vector<16x48xf32>
    %183 = arith.mulf %176, %182 : vector<16x48xf32>
    %c1_127 = arith.constant 1 : index
    %c0_128 = arith.constant 0 : index
    %c0_129 = arith.constant 0 : index
    %c0_130 = arith.constant 0 : index
    %184 = vector.load %arg11[%c1_127, %c0_128, %c0_129, %c0_130] : memref<2x2x32x16xbf16, #tpu.memory_space<vmem>>, vector<1x1x32x16xbf16>
    %185 = vector.shape_cast %184 : vector<1x1x32x16xbf16> to vector<32x16xbf16>
    %c1_131 = arith.constant 1 : index
    %c0_132 = arith.constant 0 : index
    %c0_133 = arith.constant 0 : index
    %c0_134 = arith.constant 0 : index
    %186 = vector.load %arg12[%c1_131, %c0_132, %c0_133, %c0_134] : memref<2x2x32x1xf32, #tpu.memory_space<vmem>>, vector<1x1x32x1xf32>
    %187 = vector.shape_cast %186 : vector<1x1x32x1xf32> to vector<32x1xf32>
    %188 = arith.truncf %183 : vector<16x48xf32> to vector<16x48xbf16>
    %cst_135 = arith.constant dense<0.000000e+00> : vector<32x48xf32>
    %189 = tpu.matmul %185, %188, %cst_135 {dimension_numbers = #tpu.dot_dimension_numbers<[1], [0], [0], [1], [0, 0, 1, 1], [], []>} : vector<32x16xbf16>, vector<16x48xbf16>, vector<32x48xf32> -> vector<32x48xf32>
    %190 = vector.broadcast %187 : vector<32x1xf32> to vector<32x48xf32>
    %191 = arith.addf %189, %190 : vector<32x48xf32>
    %192 = vector.extract_strided_slice %191 {offsets = [0, 0], sizes = [16, 48], strides = [1, 1]} : vector<32x48xf32> to vector<16x48xf32>
    %193 = arith.addf %158, %192 : vector<16x48xf32>
    %194 = vector.broadcast %1 : vector<1x48xf32> to vector<16x48xf32>
    %195 = arith.mulf %193, %194 : vector<16x48xf32>
    %196 = vector.extract_strided_slice %191 {offsets = [16, 0], sizes = [16, 48], strides = [1, 1]} : vector<32x48xf32> to vector<16x48xf32>
    %197 = arith.addf %159, %196 : vector<16x48xf32>
    %c1_136 = arith.constant 1 : index
    %c1_137 = arith.constant 1 : index
    %c0_138 = arith.constant 0 : index
    %c0_139 = arith.constant 0 : index
    %198 = vector.load %arg9[%c1_136, %c1_137, %c0_138, %c0_139] : memref<2x2x32x80xbf16, #tpu.memory_space<vmem>>, vector<1x1x32x80xbf16>
    %199 = vector.shape_cast %198 : vector<1x1x32x80xbf16> to vector<32x80xbf16>
    %c1_140 = arith.constant 1 : index
    %c1_141 = arith.constant 1 : index
    %c0_142 = arith.constant 0 : index
    %c0_143 = arith.constant 0 : index
    %200 = vector.load %arg10[%c1_140, %c1_141, %c0_142, %c0_143] : memref<2x2x32x1xf32, #tpu.memory_space<vmem>>, vector<1x1x32x1xf32>
    %201 = vector.shape_cast %200 : vector<1x1x32x1xf32> to vector<32x1xf32>
    %c0_144 = arith.constant 0 : index
    %c4_145 = arith.constant 4 : index
    %202 = vector.load %arg17[%c0_144, %c4_145] : memref<16x56xf32, #tpu.memory_space<vmem>>, vector<16x48xf32>
    tpu.vector_store %arg17[%c0_144, %c4_145], %195 {strides = array<i32>} : memref<16x56xf32, #tpu.memory_space<vmem>>, vector<16x48xf32>,
    %c0_146 = arith.constant 0 : index
    %c0_147 = arith.constant 0 : index
    %203 = vector.load %arg17[%c0_146, %c0_147] : memref<16x56xf32, #tpu.memory_space<vmem>>, vector<16x48xf32>
    %c0_148 = arith.constant 0 : index
    %c2_149 = arith.constant 2 : index
    %204 = vector.load %arg17[%c0_148, %c2_149] : memref<16x56xf32, #tpu.memory_space<vmem>>, vector<16x48xf32>
    %c0_150 = arith.constant 0 : index
    %c4_151 = arith.constant 4 : index
    %205 = vector.load %arg17[%c0_150, %c4_151] : memref<16x56xf32, #tpu.memory_space<vmem>>, vector<16x48xf32>
    %c0_152 = arith.constant 0 : index
    %c6_153 = arith.constant 6 : index
    %206 = vector.load %arg17[%c0_152, %c6_153] : memref<16x56xf32, #tpu.memory_space<vmem>>, vector<16x48xf32>
    %c0_154 = arith.constant 0 : index
    %c8_155 = arith.constant 8 : index
    %207 = vector.load %arg17[%c0_154, %c8_155] : memref<16x56xf32, #tpu.memory_space<vmem>>, vector<16x48xf32>
    %208 = tpu.concatenate %203, %204, %205, %206, %207 in 0 : vector<16x48xf32>, vector<16x48xf32>, vector<16x48xf32>, vector<16x48xf32>, vector<16x48xf32> -> vector<80x48xf32>
    %209 = arith.truncf %208 : vector<80x48xf32> to vector<80x48xbf16>
    %cst_156 = arith.constant dense<0.000000e+00> : vector<32x48xf32>
    %210 = tpu.matmul %199, %209, %cst_156 {dimension_numbers = #tpu.dot_dimension_numbers<[1], [0], [0], [1], [0, 0, 1, 1], [], []>} : vector<32x80xbf16>, vector<80x48xbf16>, vector<32x48xf32> -> vector<32x48xf32>
    %211 = vector.broadcast %201 : vector<32x1xf32> to vector<32x48xf32>
    %212 = arith.addf %210, %211 : vector<32x48xf32>
    %213 = vector.extract_strided_slice %212 {offsets = [0, 0], sizes = [16, 48], strides = [1, 1]} : vector<32x48xf32> to vector<16x48xf32>
    %214 = math.tanh %213 : vector<16x48xf32>
    %215 = vector.extract_strided_slice %212 {offsets = [16, 0], sizes = [16, 48], strides = [1, 1]} : vector<32x48xf32> to vector<16x48xf32>
    %216 = arith.negf %215 : vector<16x48xf32>
    %217 = math.exp %216 : vector<16x48xf32>
    %cst_157 = arith.constant 1.000000e+00 : f32
    %218 = vector.broadcast %cst_157 : f32 to vector<16x48xf32>
    %219 = arith.addf %218, %217 : vector<16x48xf32>
    %220 = arith.divf %218, %219 : vector<16x48xf32>
    %221 = arith.mulf %214, %220 : vector<16x48xf32>
    %c1_158 = arith.constant 1 : index
    %c1_159 = arith.constant 1 : index
    %c0_160 = arith.constant 0 : index
    %c0_161 = arith.constant 0 : index
    %222 = vector.load %arg11[%c1_158, %c1_159, %c0_160, %c0_161] : memref<2x2x32x16xbf16, #tpu.memory_space<vmem>>, vector<1x1x32x16xbf16>
    %223 = vector.shape_cast %222 : vector<1x1x32x16xbf16> to vector<32x16xbf16>
    %c1_162 = arith.constant 1 : index
    %c1_163 = arith.constant 1 : index
    %c0_164 = arith.constant 0 : index
    %c0_165 = arith.constant 0 : index
    %224 = vector.load %arg12[%c1_162, %c1_163, %c0_164, %c0_165] : memref<2x2x32x1xf32, #tpu.memory_space<vmem>>, vector<1x1x32x1xf32>
    %225 = vector.shape_cast %224 : vector<1x1x32x1xf32> to vector<32x1xf32>
    %226 = arith.truncf %221 : vector<16x48xf32> to vector<16x48xbf16>
    %cst_166 = arith.constant dense<0.000000e+00> : vector<32x48xf32>
    %227 = tpu.matmul %223, %226, %cst_166 {dimension_numbers = #tpu.dot_dimension_numbers<[1], [0], [0], [1], [0, 0, 1, 1], [], []>} : vector<32x16xbf16>, vector<16x48xbf16>, vector<32x48xf32> -> vector<32x48xf32>
    %228 = vector.broadcast %225 : vector<32x1xf32> to vector<32x48xf32>
    %229 = arith.addf %227, %228 : vector<32x48xf32>
    %230 = vector.extract_strided_slice %229 {offsets = [0, 0], sizes = [16, 48], strides = [1, 1]} : vector<32x48xf32> to vector<16x48xf32>
    %231 = arith.addf %197, %230 : vector<16x48xf32>
    %c1_167 = arith.constant 1 : index
    %c0_168 = arith.constant 0 : index
    %c0_169 = arith.constant 0 : index
    %232 = vector.load %arg13[%c1_167, %c0_168, %c0_169] : memref<2x8x16xbf16, #tpu.memory_space<vmem>>, vector<1x8x16xbf16>
    %233 = vector.shape_cast %232 : vector<1x8x16xbf16> to vector<8x16xbf16>
    %234 = vector.broadcast %1 : vector<1x48xf32> to vector<16x48xf32>
    %235 = arith.mulf %231, %234 : vector<16x48xf32>
    %c1_170 = arith.constant 1 : index
    %c0_171 = arith.constant 0 : index
    %c0_172 = arith.constant 0 : index
    %236 = vector.load %arg14[%c1_170, %c0_171, %c0_172] : memref<2x8x1xf32, #tpu.memory_space<vmem>>, vector<1x8x1xf32>
    %237 = vector.shape_cast %236 : vector<1x8x1xf32> to vector<8x1xf32>
    %238 = arith.truncf %235 : vector<16x48xf32> to vector<16x48xbf16>
    %cst_173 = arith.constant dense<0.000000e+00> : vector<8x48xf32>
    %239 = tpu.matmul %233, %238, %cst_173 {dimension_numbers = #tpu.dot_dimension_numbers<[1], [0], [0], [1], [0, 0, 1, 1], [], []>} : vector<8x16xbf16>, vector<16x48xbf16>, vector<8x48xf32> -> vector<8x48xf32>
    %240 = vector.broadcast %237 : vector<8x1xf32> to vector<8x48xf32>
    %241 = arith.addf %239, %240 : vector<8x48xf32>
    %242 = vector.extract_strided_slice %241 {offsets = [0, 0], sizes = [4, 48], strides = [1, 1]} : vector<8x48xf32> to vector<4x48xf32>
    %243 = vector.extract_strided_slice %241 {offsets = [4, 0], sizes = [4, 48], strides = [1, 1]} : vector<8x48xf32> to vector<4x48xf32>
    %244 = math.exp %243 : vector<4x48xf32>
    %245 = arith.mulf %244, %148 : vector<4x48xf32>
    %246 = arith.addf %242, %245 : vector<4x48xf32>
    %247 = vector.broadcast %1 : vector<1x48xf32> to vector<4x48xf32>
    %248 = arith.mulf %246, %247 : vector<4x48xf32>
    %249 = vector.broadcast %1 : vector<1x48xf32> to vector<4x48xf32>
    %250 = arith.mulf %243, %249 : vector<4x48xf32>
    %cst_174 = arith.constant dense<0.000000e+00> : vector<48xf32>
    %251 = vector.multi_reduction <add>, %250, %cst_174 [0] : vector<4x48xf32> to vector<48xf32>
    %252 = vector.shape_cast %251 : vector<48xf32> to vector<1x48xf32>
    %253 = arith.addf %128, %252 : vector<1x48xf32>
    %254 = tpu.concatenate %147, %248 in 0 : vector<4x48xf32>, vector<4x48xf32> -> vector<8x48xf32>
    %c0_175 = arith.constant 0 : index
    %c0_176 = arith.constant 0 : index
    %255 = vector.load %arg15[%c0_175, %c0_176] : memref<8x48xf32, #tpu.memory_space<vmem>>, vector<8x48xf32>
    tpu.vector_store %arg15[%c0_175, %c0_176], %254 {strides = array<i32>} : memref<8x48xf32, #tpu.memory_space<vmem>>, vector<8x48xf32>,
    %c0_177 = arith.constant 0 : index
    %c0_178 = arith.constant 0 : index
    %256 = vector.load %arg3[%c0_177, %c0_178] : memref<2x48xf32, #tpu.memory_space<vmem>>, vector<2x48xf32>
    %257 = vector.broadcast %1 : vector<1x48xf32> to vector<2x48xf32>
    %258 = arith.mulf %257, %256 : vector<2x48xf32>
    %cst_179 = arith.constant dense<0.000000e+00> : vector<2xf32>
    %259 = vector.multi_reduction <add>, %258, %cst_179 [1] : vector<2x48xf32> to vector<2xf32>
    %260 = vector.shape_cast %259 : vector<2xf32> to vector<2x1xf32>
    %261 = vector.broadcast %253 : vector<1x48xf32> to vector<2x48xf32>
    %262 = arith.mulf %261, %256 : vector<2x48xf32>
    %cst_180 = arith.constant dense<0.000000e+00> : vector<2xf32>
    %263 = vector.multi_reduction <add>, %262, %cst_180 [1] : vector<2x48xf32> to vector<2xf32>
    %264 = vector.shape_cast %263 : vector<2xf32> to vector<2x1xf32>
    %c0_181 = arith.constant 0 : index
    %265 = memref.load %arg0[%c0_181] : memref<1xf32, #tpu.memory_space<smem>>
    %266 = vector.broadcast %265 : f32 to vector<2x1xf32>
    %267 = arith.mulf %266, %260 : vector<2x1xf32>
    %268 = arith.addf %264, %267 : vector<2x1xf32>
    %c0_182 = arith.constant 0 : index
    %c0_183 = arith.constant 0 : index
    %269 = vector.load %arg16[%c0_182, %c0_183] : memref<2x1xf32, #tpu.memory_space<vmem>>, vector<2x1xf32>
    tpu.vector_store %arg16[%c0_182, %c0_183], %268 {strides = array<i32>} : memref<2x1xf32, #tpu.memory_space<vmem>>, vector<2x1xf32>,
    return
  }
}

</mosaic_0001>

<bundles_post_ra>
// kernel: flow_generator_forward.1
= control target key start
LH: loop header
LB: loop body
LE: loop exit
PB: predicated region body
PF: predicated region fallthrough
CT: control target
= control target key end

     0   :  { %v2015_v0 = vmov 0   ;;  %v2016_v5 = vmov 0.0   ;;  %vm2017_vm0 = vmmov 0   ;;  %vm88_vm1 = vcmask 1043456   ;;  %s2018_s22 = smov 4   ;;  %s2019_s24 = smov 125   ;;  %s2481_s5 = inlined_call_operand.vmem [shape: f32[2,8,1], index: 5, kind: input, shape index: {}]   ;;  %s2482_s4 = inlined_call_operand.vmem [shape: f32[2,8,1], index: 4, kind: input, shape index: {}]   ;;  %s2483_s1 = inlined_call_operand.vmem [shape: f32[8,48], index: 1, kind: input, shape index: {}]   ;;  %s2484_s2 = inlined_call_operand.vmem [shape: f32[1,48], index: 2, kind: input, shape index: {}]   ;;  %s2485_s6 = inlined_call_operand.vmem [shape: bf16[2,8,8], index: 6, kind: input, shape index: {}]   ;;  %s2486_s7 = inlined_call_operand.vmem [shape: bf16[2,16,4], index: 7, kind: input, shape index: {}]   ;;  %s2487_s8 = inlined_call_operand.vmem [shape: f32[2,16,1], index: 8, kind: input, shape index: {}]   ;;  %s2488_s10 = inlined_call_operand.vmem [shape: f32[2,2,32,1], index: 10, kind: input, shape index: {}]   ;;  %s2489_s9 = inlined_call_operand.vmem [shape: bf16[2,2,32,80], index: 9, kind: input, shape index: {}]   ;;  %s2490_s12 = inlined_call_operand.vmem [shape: f32[2,2,32,1], index: 12, kind: input, shape index: {}]   ;;  %s2491_s11 = inlined_call_operand.vmem [shape: bf16[2,2,32,16], index: 11, kind: input, shape index: {}]   ;;  %s2492_s14 = inlined_call_operand.vmem [shape: f32[2,8,1], index: 14, kind: input, shape index: {}]   ;;  %s2493_s13 = inlined_call_operand.vmem [shape: bf16[2,8,16], index: 13, kind: input, shape index: {}]   ;;  %s2494_s3 = inlined_call_operand.vmem [shape: f32[2,48], index: 3, kind: input, shape index: {}]   ;;  %s2495_s15 = inlined_call_operand.vmem [shape: f32[8,48], index: 15, kind: output, shape index: {0}]   ;;  %s2496_s0 = inlined_call_operand.<no memory space> [shape: f32[1], index: 0, kind: input, shape index: {}]   ;;  %s2497_s16 = inlined_call_operand.vmem [shape: f32[2,1], index: 16, kind: output, shape index: {1}]  }
   0x1   :  { %2500 = sst [smem:[#allocation4_spill]] %s2481_s5  ;;  %1858 = vset.pattern.permute.xlu0 %v2015_v0  ;;  %1859 = vset.pattern.permute.xlu1 %v2015_v0  ;;  %v59_v4 = vld [vmem:[%s2482_s4] sm:$0xff]  ;;  %vm84_vm2 = vcmask 64512   ;;  %v136_v17 = vld [vmem:[%s2487_s8 + $0x8] sm:$0xff]  ;;  %vm157_vm3 = vcmask 1041408   ;;  %vm153_vm4 = vcmask 31744  }
   0x2   :  { %s2501_s23 = sld [smem:[#allocation4_spill]]  ;;  %1732 = vmatprep.subr.bf16.mxu0 %v2016_v5  ;;  %1738 = vmatprep.subr.bf16.mxu1 %v2016_v5  ;;  %v54_v7 = vld [vmem:[%s2483_s1] sm:$0xff]  ;;  %vm56_vm5 = vcmask 457728   ;;  %vm220_vm6 = vcmask 424992   ;;  %s2020_s25 = smov 124   ;;  %v210_v57 = vld [vmem:[%s2488_s10 + $0x10] sm:$0xff] }
   0x3   :  { %1734 = vmatprep.mubr.msk.bf16.mxu0 %vm2017_vm0, %v2016_v5  ;;  %1740 = vmatprep.mubr.msk.bf16.mxu1 %vm2017_vm0, %v2016_v5  ;;  %v2128_v10 = vld [vmem:[%s2484_s2] ss:$0 sm:$0xff]  ;;  %57 = vst.msk [vmem:[#allocation2] sm:$0xff] %vm56_vm5, %v2016_v5  ;;  %58 = vst.msk [vmem:[#allocation2 + $0x8] sm:$0xff] %vm56_vm5, %v2016_v5  ;;  %s2021_s26 = smov 127   ;;  %s2022_s27 = smov 126  }
   0x4   :  { %v82_v15 = vld [vmem:[%s2485_s6] sm:$0xf]  ;;  %vm306_vm7 = vcmask 654336   ;;  %v211_v61 = vld [vmem:[%s2488_s10 + $0x18] sm:$0xff]  ;;  %v209_v63 = vld [vmem:[%s2488_s10 + $0x8] sm:$0xff]  ;;  %vm417_vm8 = vcmask 130048  }
   0x5   :  { %v135_v16 = vld [vmem:[%s2487_s8] sm:$0xff]  ;;  %v383_v0 = vld [vmem:[%s2490_s12 + $0x8] sm:$0xff]  ;;  %s2023_s28 = smov 122   ;;  %s2499_s29 = smov 120   ;;  %vm1552_vm9 = vcmask 386048   ;;  %vm792_vm10 = vcmask 388096  }
   0x6   :  { %140 = vperm.xlu1 %1859, %v135_v16   ;;  %v1940_v24 = vld [vmem:[%s2486_s7] sm:$0xff]   ;;  %vm1548_vm11 = vcmask 392192   ;;  %vm1564_vm12 = vcmask 1024  }
   0x7   :  { %v1941_v58 = vld [vmem:[%s2489_s9] sm:$0xff]  }
   0x8   :  { %v60_v1 = vld [vmem:[%s2501_s23] sm:$0xff] }
   0x9   :  { %v61_v2 = vmul.f32 1.442695, %v60_v1  ;;  %v208_v60 = vld [vmem:[%s2488_s10] sm:$0xff] }
   0xa   :  { %145 = vperm.xlu1 %1859, %v136_v17   ;;  %v382_v62 = vld [vmem:[%s2490_s12] sm:$0xff] }
   0xb   :  { %1958 = vpow2.f32 %v61_v2 }
  0x18   :  { %v1959_v3 = vpop.eup %1958 }
  0x19   :  { %65 = vperm.xlu0 %1858, %v1959_v3  }
  0x1d   :  { %71 = vperm.xlu0 %1858, %v59_v4  }
  0x81   :  { %v141_v26 = vpop.permute.xlu1 %140 }
  0x85   :  { %v146_v31 = vpop.permute.xlu1 %145 }
  0x94   :  { %v66_v6 = vpop.permute.xlu0 %65 }
  0x95   :  { %v68_v8 = vmul.f32 %v66_v6, %v54_v7  ;;  %v1942_v7 = vld [vmem:[%s2489_s9 + $0x8] sm:$0xff]  }
  0x98   :  { %v72_v9 = vpop.permute.xlu0 %71 }
  0x99   :  { %v74_v11 = vadd.f32 %v72_v9, %v68_v8  ;;  %v1943_v8 = vld [vmem:[%s2491_s11] sm:$0xff]  }
  0x9b   :  { %v81_v12 = vmul.f32 %v2128_v10, %v74_v11 }
  0x9d   :  { %v83_v13 = vpack.c.bf16 %v81_v12, %v81_v12 }
  0x9f   :  { %v90_v14 = vsel %vm88_vm1, %v83_v13, 0 }
  0xa0   :  { %1733 = vmatpush3.bf16.msra.mxu0 %v90_v14 }
  0xa3   :  { %1735 = vmatmul.mubr.msk.bf16.vlgmr.msra.gmra.mxu0 %vm84_vm2, %v82_v15 }
  0xa4   :  { %1754 = vmatprep.mubr.msk.bf16.mxu0 %vm306_vm7, %v1941_v58  ;;  %v1945_v58 = vld [vmem:[%s2489_s9 + $0x10] sm:$0xff]  }
 0x163   :  { %v126_v18 = vpop.f32.mrf.mxu0 }
 0x164   :  { %v2143_v19 = vmul.f32 %v2128_v10, %v126_v18 }
 0x165   :  { %v1736_v20 = vpop.f32.mrf.mxu0 }
 0x166   :  { %v137_v21 = vpack.c.bf16 %v2143_v19, %v2143_v19 }
 0x167   :  { %v129_v22 = vpop.f32.mrf.mxu0 }
 0x168   :  { %v159_v23 = vsel %vm157_vm3, %v137_v21, 0 }
 0x169   :  { %v1737_v25 = vpop.f32.mrf.mxu0  ;;  %1739 = vmatpush3.bf16.msra.mxu1 %v159_v23 }
 0x16c   :  { %1741 = vmatmul.mubr.msk.bf16.vlgmr.msra.gmra.mxu1 %vm153_vm4, %v1940_v24 }
 0x16d   :  { %1760 = vmatprep.mubr.msk.bf16.mxu1 %vm417_vm8, %v1943_v8 }
 0x22c   :  { %v195_v27 = vpop.f32.mrf.mxu1 }
 0x22d   :  { %v196_v28 = vadd.f32 %v195_v27, %v141_v26 }
 0x22e   :  { %v1742_v29 = vpop.f32.mrf.mxu1 }
 0x22f   :  { %v2155_v30 = vmul.f32 %v2128_v10, %v196_v28 }
 0x230   :  { %v198_v32 = vpop.f32.mrf.mxu1 }
 0x231   :  { %v199_v33 = vadd.f32 %v198_v32, %v146_v31  ;;  %214 = vrot.lane.b32.xlu0 %v2155_v30, %s2018_s22 }
 0x232   :  { %v1743_v34 = vpop.f32.mrf.mxu1 }
 0x233   :  { %v2160_v35 = vmul.f32 %v2128_v10, %v199_v33 }
 0x235   :  { %216 = vrot.lane.b32.xlu1 %v2160_v35, %s2018_s22 }
 0x2a3   :  { %v215_v36 = vpop.permute.xlu0 %214 }
 0x2a4   :  { %221 = vst.msk [vmem:[#allocation2] sm:$0xff] %vm220_vm6, %v215_v36 }
 0x2a7   :  { %v217_v37 = vpop.permute.xlu1 %216 }
 0x2a8   :  { %222 = vst.msk [vmem:[#allocation2 + $0x8] sm:$0xff] %vm220_vm6, %v217_v37 }
 0x2ab   :  { %v223_v38 = vld [vmem:[#allocation2] sm:$0xff] }
 0x2af   :  { %v224_v39 = vld [vmem:[#allocation2 + $0x8] sm:$0xff] }
 0x2b0   :  { %v1865_v40 = vpack.i.bf16 %v224_v39, %v223_v38  ;;  %v251_v59 = vpack.c.bf16 %v224_v39, %v223_v38  ;;  %v1944_v38 = vld [vmem:[%s2491_s11 + $0x8] sm:$0xff]  }
 0x2b2   :  { %1866 = vrot.lane.b32.xlu1 %v1865_v40, %s2019_s24  ;;  %1861 = vrot.lane.b32.xlu0 %v1865_v40, %s2020_s25 }
 0x2b6   :  { %1876 = vrot.lane.b32.xlu1 %v1865_v40, %s2021_s26  ;;  %1871 = vrot.lane.b32.xlu0 %v1865_v40, %s2022_s27 }
 0x324   :  { %v1867_v41 = vpop.permute.xlu1 %1866  ;;  %v1862_v42 = vpop.permute.xlu0 %1861 }
 0x325   :  { %v1869_v43 = vunpack.i.h.bf16 %v1867_v41  ;;  %v1868_v44 = vunpack.i.l.bf16 %v1867_v41  ;;  %v1864_v45 = vunpack.i.h.bf16 %v1862_v42  ;;  %v1863_v46 = vunpack.i.l.bf16 %v1862_v42 }
 0x327   :  { %v254_v47 = vpack.c.bf16 %v1869_v43, %v1868_v44  ;;  %v255_v48 = vpack.c.bf16 %v1864_v45, %v1863_v46 }
 0x328   :  { %v1877_v49 = vpop.permute.xlu1 %1876  ;;  %v1872_v50 = vpop.permute.xlu0 %1871 }
 0x329   :  { %v1879_v51 = vunpack.i.h.bf16 %v1877_v49  ;;  %v1878_v52 = vunpack.i.l.bf16 %v1877_v49  ;;  %v1874_v53 = vunpack.i.h.bf16 %v1872_v50  ;;  %v1873_v54 = vunpack.i.l.bf16 %v1872_v50  ;;  %297 = vrot.lane.b32.xlu1 %v254_v47, %s2022_s27  ;;  %299 = vrot.lane.b32.xlu0 %v255_v48, %s2022_s27 }
 0x32b   :  { %v252_v55 = vpack.c.bf16 %v1879_v51, %v1878_v52  ;;  %v253_v56 = vpack.c.bf16 %v1874_v53, %v1873_v54 }
 0x32d   :  { %293 = vrot.lane.b32.xlu1 %v252_v55, %s2022_s27  ;;  %295 = vrot.lane.b32.xlu0 %v253_v56, %s2022_s27  ;;  %v1595_v56 = vld [vmem:[%s2488_s10 + $0x38] sm:$0xff] }
 0x331   :  { %268 = vperm.xlu1 %1859, %v210_v57   ;;  %291 = vrot.lane.b32.xlu0 %v251_v59, %s2022_s27  ;;  %v1594_v57 = vld [vmem:[%s2488_s10 + $0x30] sm:$0xff]  ;;  %v1593_v59 = vld [vmem:[%s2488_s10 + $0x28] sm:$0xff] }
 0x335   :  { %258 = vperm.xlu1 %1859, %v208_v60   ;;  %273 = vperm.xlu0 %1858, %v211_v61   ;;  %v1592_v60 = vld [vmem:[%s2488_s10 + $0x20] sm:$0xff]  ;;  %v385_v61 = vld [vmem:[%s2490_s12 + $0x18] sm:$0xff] }
 0x339   :  { %389 = vperm.xlu1 %1859, %v382_v62   ;;  %263 = vperm.xlu0 %1858, %v209_v63   ;;  %v384_v62 = vld [vmem:[%s2490_s12 + $0x10] sm:$0xff]  ;;  %v1607_v63 = vld [vmem:[%s2490_s12 + $0x28] sm:$0xff] }
 0x33d   :  { %394 = vperm.xlu0 %1858, %v383_v0   ;;  %v1606_v0 = vld [vmem:[%s2490_s12 + $0x20] sm:$0xff] }
 0x39b   :  { %v300_v1 = vpop.permute.xlu0 %299  ;;  %v298_v2 = vpop.permute.xlu1 %297 }
 0x39c   :  { %1744 = vmatprep.subr.bf16.mxu0 %v300_v1 }
 0x39d   :  { %1745 = vmatpush3.bf16.msra.mxu0 %v300_v1 }
 0x39e   :  { %1746 = vmatprep.subr.bf16.mxu0 %v298_v2 }
 0x39f   :  { %v296_v3 = vpop.permute.xlu0 %295  ;;  %v294_v4 = vpop.permute.xlu1 %293 }
 0x3a1   :  { %1747 = vmatpush3.bf16.msra.mxu0 %v298_v2  ;;  %v730_v2 = vld [vmem:[%s2492_s14] sm:$0xff] }
 0x3a2   :  { %1748 = vmatprep.subr.bf16.mxu0 %v296_v3 }
 0x3a3   :  { %v292_v6 = vpop.permute.xlu0 %291 }
 0x3a5   :  { %1749 = vmatpush3.bf16.msra.mxu0 %v296_v3  ;;  %v1621_v3 = vld [vmem:[%s2487_s8 + $0x10] sm:$0xff] }
 0x3a6   :  { %1750 = vmatprep.subr.bf16.mxu0 %v294_v4 }
 0x3a9   :  { %1751 = vmatpush3.bf16.msra.mxu0 %v294_v4  ;;  %v1615_v4 = vld [vmem:[%s2482_s4 + $0x8] sm:$0xff] }
 0x3aa   :  { %1752 = vmatprep.subr.bf16.mxu0 %v292_v6 }
 0x3ac   :  { %v269_v9 = vpop.permute.xlu1 %268 }
 0x3ad   :  { %1753 = vmatpush3.bf16.msra.mxu0 %v292_v6  ;;  %v1622_v6 = vld [vmem:[%s2487_s8 + $0x18] sm:$0xff] }
 0x3b0   :  { %1755 = vmatmul.mubr.msk.bf16.vlgmr.msra.gmra.mxu0 %vm306_vm7, %v1942_v7  ;;  %v274_v15 = vpop.permute.xlu0 %273  ;;  %v259_v20 = vpop.permute.xlu1 %258 }
 0x3b4   :  { %v264_v24 = vpop.permute.xlu0 %263  ;;  %v390_v40 = vpop.permute.xlu1 %389 }
 0x3b8   :  { %v395_v45 = vpop.permute.xlu0 %394 }
 0x470   :  { %v1756_v11 = vpop.f32.mrf.mxu0 }
 0x471   :  { %v356_v12 = vadd.f32 %v1756_v11, %v269_v9 }
 0x472   :  { %v347_v13 = vpop.f32.mrf.mxu0 }
 0x473   :  { %v1582_v14 = vmul.f32 -1.442695, %v356_v12  ;;  %v348_v23 = vadd.f32 %v347_v13, %v259_v20 }
 0x474   :  { %v1757_v16 = vpop.f32.mrf.mxu0 }
 0x475   :  { %1960 = vpow2.f32 %v1582_v14  ;;  %v359_v17 = vadd.f32 %v1757_v16, %v274_v15 }
 0x476   :  { %v350_v21 = vpop.f32.mrf.mxu0 }
 0x477   :  { %v1583_v18 = vmul.f32 -1.442695, %v359_v17  ;;  %v351_v26 = vadd.f32 %v350_v21, %v264_v24 }
 0x479   :  { %1962 = vpow2.f32 %v1583_v18 }
 0x47a   :  { %1964 = vtanh.f32 %v348_v23 }
 0x482   :  { %v1961_v22 = vpop.eup %1960 }
 0x483   :  { %v370_v25 = vadd.f32 1.0, %v1961_v22 }
 0x485   :  { %1966 = vrcp.f32 %v370_v25 }
 0x486   :  { %v1963_v27 = vpop.eup %1962  ;;  %1968 = vtanh.f32 %v351_v26  ;;  %v1946_v26 = vld [vmem:[%s2489_s9 + $0x18] sm:$0xff]  }
 0x487   :  { %v371_v28 = vadd.f32 1.0, %v1963_v27  ;;  %v1965_v29 = vpop.eup %1964  ;;  %v1947_v27 = vld [vmem:[%s2491_s11 + $0x10] sm:$0xff]  }
 0x488   :  { %1780 = vmatprep.mubr.msk.bf16.mxu0 %vm417_vm8, %v1947_v27 }
 0x489   :  { %1970 = vrcp.f32 %v371_v28 }
 0x492   :  { %v1967_v31 = vpop.eup %1966 }
 0x493   :  { %v1969_v32 = vpop.eup %1968  ;;  %v376_v34 = vmul.f32 %v1967_v31, %v1965_v29 }
 0x496   :  { %v1971_v33 = vpop.eup %1970 }
 0x497   :  { %v377_v36 = vmul.f32 %v1971_v33, %v1969_v32 }
 0x499   :  { %v386_v37 = vpack.c.bf16 %v377_v36, %v376_v34 }
 0x49b   :  { %1758 = vmatprep.subr.bf16.mxu1 %v386_v37 }
 0x49c   :  { %1759 = vmatpush3.bf16.msra.mxu1 %v386_v37 }
 0x49f   :  { %1761 = vmatmul.mubr.msk.bf16.vlgmr.msra.gmra.mxu1 %vm417_vm8, %v1944_v38 }
 0x4a0   :  { %1774 = vmatprep.mubr.msk.bf16.mxu1 %vm306_vm7, %v1945_v58 }
 0x55f   :  { %v2209_v39 = vpop.f32.mrf.mxu1 }
 0x561   :  { %v458_v41 = vpop.f32.mrf.mxu1 }
 0x562   :  { %v459_v42 = vadd.f32 %v458_v41, %v390_v40 }
 0x563   :  { %v2211_v43 = vpop.f32.mrf.mxu1 }
 0x564   :  { %v473_v44 = vadd.f32 %v459_v42, %v2155_v30 }
 0x565   :  { %v461_v46 = vpop.f32.mrf.mxu1 }
 0x566   :  { %v462_v47 = vadd.f32 %v461_v46, %v395_v45  ;;  %v475_v48 = vmul.f32 %v2128_v10, %v473_v44 }
 0x568   :  { %v474_v49 = vadd.f32 %v462_v47, %v2160_v35  ;;  %491 = vrot.lane.b32.xlu1 %v475_v48, %s2018_s22  ;;  %v1616_v35 = vld [vmem:[%s2501_s23 + $0x8] sm:$0xff] }
 0x569   :  { %v809_v55 = vmul.f32 1.442695, %v1616_v35 }
 0x56a   :  { %v476_v50 = vmul.f32 %v2128_v10, %v474_v49 }
 0x56b   :  { %1972 = vpow2.f32 %v809_v55  ;;  %v1948_v55 = vld [vmem:[%s2491_s11 + $0x18] sm:$0xff]  }
 0x56c   :  { %493 = vrot.lane.b32.xlu0 %v476_v50, %s2018_s22 }
 0x578   :  { %v1973_v1 = vpop.eup %1972 }
 0x5da   :  { %v492_v51 = vpop.permute.xlu1 %491 }
 0x5db   :  { %497 = vst.msk [vmem:[#allocation2] sm:$0xff] %vm220_vm6, %v492_v51 }
 0x5de   :  { %v494_v52 = vpop.permute.xlu0 %493 }
 0x5df   :  { %498 = vst.msk [vmem:[#allocation2 + $0x8] sm:$0xff] %vm220_vm6, %v494_v52 }
 0x5e2   :  { %v2221_v30 = vld [vmem:[#allocation2] sm:$0xff] }
 0x5e6   :  { %v2223_v53 = vld [vmem:[#allocation2 + $0x8] sm:$0xff] }
 0x5e7   :  { %v1885_v54 = vpack.i.bf16 %v2223_v53, %v2221_v30  ;;  %v527_v25 = vpack.c.bf16 %v2223_v53, %v2221_v30 }
 0x5e9   :  { %1886 = vrot.lane.b32.xlu0 %v1885_v54, %s2023_s28  ;;  %1881 = vrot.lane.b32.xlu1 %v1885_v54, %s2499_s29  ;;  %s2502_s29 = smov 120  }
 0x5ed   :  { %1896 = vrot.lane.b32.xlu0 %v1885_v54, %s2022_s27  ;;  %1891 = vrot.lane.b32.xlu1 %v1885_v54, %s2020_s25 }
 0x5f1   :  { %549 = vperm.xlu0 %1858, %v1595_v56   ;;  %544 = vperm.xlu1 %1859, %v1594_v57  }
 0x5f5   :  { %539 = vperm.xlu0 %1858, %v1593_v59   ;;  %534 = vperm.xlu1 %1859, %v1592_v60  }
 0x5f9   :  { %404 = vperm.xlu0 %1858, %v385_v61   ;;  %399 = vperm.xlu1 %1859, %v384_v62  }
 0x5fd   :  { %651 = vperm.xlu0 %1858, %v1607_v63   ;;  %646 = vperm.xlu1 %1859, %v1606_v0  }
 0x601   :  { %813 = vperm.xlu0 %1858, %v1973_v1   ;;  %734 = vperm.xlu1 %1859, %v730_v2  }
 0x605   :  { %883 = vperm.xlu0 %1858, %v1621_v3   ;;  %819 = vperm.xlu1 %1859, %v1615_v4  }
 0x609   :  { %888 = vperm.xlu1 %1859, %v1622_v6  }
 0x65b   :  { %v1887_v7 = vpop.permute.xlu0 %1886  ;;  %v1882_v8 = vpop.permute.xlu1 %1881 }
 0x65c   :  { %v1889_v9 = vunpack.i.h.bf16 %v1887_v7  ;;  %v1888_v11 = vunpack.i.l.bf16 %v1887_v7  ;;  %v1884_v12 = vunpack.i.h.bf16 %v1882_v8  ;;  %v1883_v13 = vunpack.i.l.bf16 %v1882_v8 }
 0x65e   :  { %v531_v14 = vpack.c.bf16 %v1884_v12, %v1883_v13  ;;  %v530_v16 = vpack.c.bf16 %v1889_v9, %v1888_v11  ;;  %v727_v11 = vld [vmem:[%s2493_s13] sm:$0xf] }
 0x65f   :  { %v1892_v15 = vpop.permute.xlu1 %1891  ;;  %v1897_v20 = vpop.permute.xlu0 %1896 }
 0x660   :  { %v1894_v17 = vunpack.i.h.bf16 %v1892_v15  ;;  %v1893_v18 = vunpack.i.l.bf16 %v1892_v15  ;;  %1764 = vmatprep.subr.bf16.mxu1 %v531_v14  ;;  %v1899_v21 = vunpack.i.h.bf16 %v1897_v20  ;;  %v1898_v22 = vunpack.i.l.bf16 %v1897_v20 }
 0x661   :  { %1765 = vmatpush3.bf16.msra.mxu1 %v531_v14 }
 0x662   :  { %1766 = vmatprep.subr.bf16.mxu1 %v530_v16  ;;  %v529_v23 = vpack.c.bf16 %v1894_v17, %v1893_v18  ;;  %v528_v24 = vpack.c.bf16 %v1899_v21, %v1898_v22 }
 0x665   :  { %1767 = vmatpush3.bf16.msra.mxu1 %v530_v16 }
 0x666   :  { %1768 = vmatprep.subr.bf16.mxu1 %v529_v23 }
 0x669   :  { %1769 = vmatpush3.bf16.msra.mxu1 %v529_v23 }
 0x66a   :  { %1770 = vmatprep.subr.bf16.mxu1 %v528_v24 }
 0x66c   :  { %v545_v28 = vpop.permute.xlu1 %544  ;;  %v550_v34 = vpop.permute.xlu0 %549 }
 0x66d   :  { %1771 = vmatpush3.bf16.msra.mxu1 %v528_v24 }
 0x66e   :  { %1772 = vmatprep.subr.bf16.mxu1 %v527_v25 }
 0x670   :  { %v535_v40 = vpop.permute.xlu1 %534  ;;  %v540_v45 = vpop.permute.xlu0 %539 }
 0x671   :  { %1773 = vmatpush3.bf16.msra.mxu1 %v527_v25 }
 0x672   :  { %1790 = vmatprep.subr.bf16.mxu1 %v2016_v5 }
 0x674   :  { %1775 = vmatmul.mubr.msk.bf16.vlgmr.msra.gmra.mxu1 %vm306_vm7, %v1946_v26  ;;  %v400_v56 = vpop.permute.xlu1 %399  ;;  %v405_v57 = vpop.permute.xlu0 %404 }
 0x675   :  { %1792 = vmatprep.mubr.msk.bf16.mxu1 %vm2017_vm0, %v2016_v5  ;;  %v467_v63 = vadd.f32 %v2209_v39, %v400_v56  ;;  %v470_v2 = vadd.f32 %v2211_v43, %v405_v57 }
 0x678   :  { %v647_v59 = vpop.permute.xlu1 %646  ;;  %v652_v0 = vpop.permute.xlu0 %651 }
 0x67c   :  { %v735_v39 = vpop.permute.xlu1 %734  ;;  %v814_v24 = vpop.permute.xlu0 %813 }
 0x680   :  { %v820_v27 = vpop.permute.xlu1 %819 }
 0x734   :  { %v1776_v29 = vpop.f32.mrf.mxu1 }
 0x735   :  { %v611_v31 = vadd.f32 %v1776_v29, %v545_v28 }
 0x736   :  { %v602_v32 = vpop.f32.mrf.mxu1 }
 0x737   :  { %v1600_v33 = vmul.f32 -1.442695, %v611_v31  ;;  %v603_v44 = vadd.f32 %v602_v32, %v535_v40 }
 0x738   :  { %v1777_v36 = vpop.f32.mrf.mxu1 }
 0x739   :  { %1974 = vpow2.f32 %v1600_v33  ;;  %v614_v37 = vadd.f32 %v1777_v36, %v550_v34  ;;  %v1617_v33 = vld [vmem:[%s2485_s6 + $0x4] sm:$0xf] }
 0x73a   :  { %v605_v41 = vpop.f32.mrf.mxu1 }
 0x73b   :  { %v1601_v38 = vmul.f32 -1.442695, %v614_v37  ;;  %v606_v47 = vadd.f32 %v605_v41, %v540_v45  ;;  %v1949_v41 = vld [vmem:[%s2486_s7 + $0x8] sm:$0xff]  }
 0x73d   :  { %1976 = vpow2.f32 %v1601_v38 }
 0x73e   :  { %1978 = vtanh.f32 %v603_v44  ;;  %v884_v44 = vpop.permute.xlu0 %883 }
 0x746   :  { %v1975_v42 = vpop.eup %1974 }
 0x747   :  { %v625_v46 = vadd.f32 1.0, %v1975_v42 }
 0x749   :  { %1980 = vrcp.f32 %v625_v46 }
 0x74a   :  { %v1977_v48 = vpop.eup %1976  ;;  %1982 = vtanh.f32 %v606_v47 }
 0x74b   :  { %v626_v49 = vadd.f32 1.0, %v1977_v48  ;;  %v1979_v50 = vpop.eup %1978 }
 0x74d   :  { %1984 = vrcp.f32 %v626_v49  ;;  %v889_v49 = vpop.permute.xlu1 %888 }
 0x756   :  { %v1981_v51 = vpop.eup %1980 }
 0x757   :  { %v1983_v52 = vpop.eup %1982  ;;  %v631_v53 = vmul.f32 %v1981_v51, %v1979_v50 }
 0x75a   :  { %v1985_v30 = vpop.eup %1984 }
 0x75b   :  { %v632_v54 = vmul.f32 %v1985_v30, %v1983_v52 }
 0x75d   :  { %v643_v35 = vpack.c.bf16 %v632_v54, %v631_v53 }
 0x75f   :  { %1778 = vmatprep.subr.bf16.mxu0 %v643_v35 }
 0x760   :  { %1779 = vmatpush3.bf16.msra.mxu0 %v643_v35 }
 0x761   :  { %1784 = vmatprep.subr.bf16.mxu0 %v2016_v5 }
 0x763   :  { %1781 = vmatmul.mubr.msk.bf16.vlgmr.msra.gmra.mxu0 %vm417_vm8, %v1948_v55 }
 0x764   :  { %1786 = vmatprep.mubr.msk.bf16.mxu0 %vm2017_vm0, %v2016_v5 }
 0x823   :  { %v1782_v58 = vpop.f32.mrf.mxu0 }
 0x825   :  { %v712_v60 = vpop.f32.mrf.mxu0 }
 0x826   :  { %v713_v61 = vadd.f32 %v712_v60, %v647_v59 }
 0x827   :  { %v1783_v62 = vpop.f32.mrf.mxu0 }
 0x828   :  { %v725_v3 = vadd.f32 %v713_v61, %v467_v63 }
 0x829   :  { %v715_v1 = vpop.f32.mrf.mxu0 }
 0x82a   :  { %v716_v4 = vadd.f32 %v715_v1, %v652_v0  ;;  %v728_v7 = vmul.f32 %v2128_v10, %v725_v3 }
 0x82c   :  { %v726_v6 = vadd.f32 %v716_v4, %v470_v2 }
 0x82e   :  { %v729_v8 = vmul.f32 %v2128_v10, %v726_v6 }
 0x830   :  { %v731_v9 = vpack.c.bf16 %v729_v8, %v728_v7 }
 0x832   :  { %1785 = vmatpush3.bf16.msra.mxu0 %v731_v9 }
 0x833   :  { %1796 = vmatprep.subr.bf16.mxu0 %v2016_v5 }
 0x835   :  { %1787 = vmatmul.mubr.msk.bf16.vlgmr.msra.gmra.mxu0 %vm417_vm8, %v727_v11  ;;  %v1950_v11 = vld [vmem:[%s2489_s9 + $0x20] sm:$0xff]  }
 0x836   :  { %1798 = vmatprep.mubr.msk.bf16.mxu0 %vm2017_vm0, %v2016_v5 }
 0x8f5   :  { %v774_v43 = vpop.f32.mrf.mxu0 }
 0x8f6   :  { %v2305_v12 = vadd.f32 %v774_v43, %v735_v39  ;;  %v1631_v39 = vld [vmem:[%s2488_s10 + $0x50] sm:$0xff] }
 0x8f7   :  { %v1788_v13 = vpop.f32.mrf.mxu0 }
 0x8f8   :  { %v780_v14 = vmul.f32 1.442695, %v2305_v12  ;;  %v1629_v13 = vld [vmem:[%s2488_s10 + $0x40] sm:$0xff] }
 0x8f9   :  { %v777_v15 = vpop.f32.mrf.mxu0 }
 0x8fa   :  { %1986 = vpow2.f32 %v780_v14  ;;  %v1632_v14 = vld [vmem:[%s2488_s10 + $0x58] sm:$0xff]  ;;  %v1643_v15 = vld [vmem:[%s2490_s12 + $0x40] sm:$0xff] }
 0x8fb   :  { %v1789_v16 = vpop.f32.mrf.mxu0 }
 0x8fc   :  { %v1630_v16 = vld [vmem:[%s2488_s10 + $0x48] sm:$0xff] }
 0x907   :  { %v1987_v17 = vpop.eup %1986 }
 0x908   :  { %v782_v18 = vmul.f32 %v1987_v17, %v2143_v19  ;;  %v1644_v17 = vld [vmem:[%s2490_s12 + $0x48] sm:$0xff] }
 0x90a   :  { %v784_v20 = vrot.slane %v782_v18, 4 }
 0x90c   :  { %v786_v21 = vadd.f32 %v784_v20, %v2305_v12 }
 0x90e   :  { %v787_v22 = vmul.f32 %v2128_v10, %v786_v21 }
 0x910   :  { %v802_v23 = vrot.slane %v787_v22, 4 }
 0x912   :  { %v804_v25 = vsel %vm88_vm1, %v2143_v19, %v802_v23 }
 0x913   :  { %v816_v26 = vmul.f32 %v814_v24, %v804_v25  ;;  %v1951_v24 = vld [vmem:[%s2489_s9 + $0x28] sm:$0xff]   ;;  %v1952_v25 = vld [vmem:[%s2491_s11 + $0x20] sm:$0xff]  }
 0x915   :  { %v822_v28 = vadd.f32 %v820_v27, %v816_v26 }
 0x917   :  { %v823_v29 = vmul.f32 %v2128_v10, %v822_v28 }
 0x919   :  { %v826_v31 = vpack.c.bf16 %v823_v29, %v823_v29 }
 0x91b   :  { %v831_v32 = vsel %vm88_vm1, %v826_v31, 0 }
 0x91c   :  { %1791 = vmatpush3.bf16.msra.mxu1 %v831_v32 }
 0x91f   :  { %1793 = vmatmul.mubr.msk.bf16.vlgmr.msra.gmra.mxu1 %vm84_vm2, %v1617_v33 }
 0x920   :  { %1812 = vmatprep.mubr.msk.bf16.mxu1 %vm306_vm7, %v1950_v11  ;;  %v1657_v11 = vld [vmem:[%s2488_s10 + $0x70] sm:$0xff] }
 0x9df   :  { %v867_v34 = vpop.f32.mrf.mxu1 }
 0x9e0   :  { %v2320_v36 = vmul.f32 %v2128_v10, %v867_v34 }
 0x9e1   :  { %v1794_v19 = vpop.f32.mrf.mxu1 }
 0x9e2   :  { %v880_v37 = vpack.c.bf16 %v2320_v36, %v2320_v36 }
 0x9e3   :  { %v870_v38 = vpop.f32.mrf.mxu1 }
 0x9e4   :  { %v900_v40 = vsel %vm157_vm3, %v880_v37, 0 }
 0x9e5   :  { %v1795_v42 = vpop.f32.mrf.mxu1  ;;  %1797 = vmatpush3.bf16.msra.mxu0 %v900_v40 }
 0x9e8   :  { %1799 = vmatmul.mubr.msk.bf16.vlgmr.msra.gmra.mxu0 %vm153_vm4, %v1949_v41 }
 0x9e9   :  { %1818 = vmatprep.mubr.msk.bf16.mxu0 %vm417_vm8, %v1952_v25 }
 0xaa8   :  { %v936_v45 = vpop.f32.mrf.mxu0 }
 0xaa9   :  { %v937_v46 = vadd.f32 %v936_v45, %v884_v44 }
 0xaaa   :  { %v1800_v47 = vpop.f32.mrf.mxu0 }
 0xaab   :  { %v2330_v48 = vmul.f32 %v2128_v10, %v937_v46 }
 0xaac   :  { %v939_v50 = vpop.f32.mrf.mxu0 }
 0xaad   :  { %v940_v51 = vadd.f32 %v939_v50, %v889_v49  ;;  %957 = vrot.lane.b32.xlu0 %v2330_v48, %s2018_s22 }
 0xaae   :  { %v1801_v52 = vpop.f32.mrf.mxu0 }
 0xaaf   :  { %v2335_v30 = vmul.f32 %v2128_v10, %v940_v51 }
 0xab1   :  { %959 = vrot.lane.b32.xlu1 %v2335_v30, %s2018_s22 }
 0xb1f   :  { %v958_v53 = vpop.permute.xlu0 %957 }
 0xb20   :  { %963 = vst.msk [vmem:[#allocation2] sm:$0xff] %vm220_vm6, %v958_v53 }
 0xb23   :  { %v960_v54 = vpop.permute.xlu1 %959 }
 0xb24   :  { %964 = vst.msk [vmem:[#allocation2 + $0x8] sm:$0xff] %vm220_vm6, %v960_v54 }
 0xb27   :  { %v965_v35 = vld [vmem:[#allocation2] sm:$0xff] }
 0xb2b   :  { %v966_v55 = vld [vmem:[#allocation2 + $0x8] sm:$0xff] }
 0xb2c   :  { %v1905_v56 = vpack.i.bf16 %v966_v55, %v965_v35  ;;  %v993_v43 = vpack.c.bf16 %v966_v55, %v965_v35  ;;  %v1953_v55 = vld [vmem:[%s2491_s11 + $0x28] sm:$0xff]  }
 0xb2e   :  { %1906 = vrot.lane.b32.xlu1 %v1905_v56, %s2019_s24  ;;  %1901 = vrot.lane.b32.xlu0 %v1905_v56, %s2020_s25 }
 0xb32   :  { %1916 = vrot.lane.b32.xlu1 %v1905_v56, %s2021_s26  ;;  %1911 = vrot.lane.b32.xlu0 %v1905_v56, %s2022_s27 }
 0xba0   :  { %v1907_v57 = vpop.permute.xlu1 %1906  ;;  %v1902_v58 = vpop.permute.xlu0 %1901 }
 0xba1   :  { %v1909_v59 = vunpack.i.h.bf16 %v1907_v57  ;;  %v1908_v60 = vunpack.i.l.bf16 %v1907_v57  ;;  %v1904_v61 = vunpack.i.h.bf16 %v1902_v58  ;;  %v1903_v62 = vunpack.i.l.bf16 %v1902_v58 }
 0xba3   :  { %v996_v63 = vpack.c.bf16 %v1909_v59, %v1908_v60  ;;  %v997_v0 = vpack.c.bf16 %v1904_v61, %v1903_v62 }
 0xba4   :  { %v1917_v1 = vpop.permute.xlu1 %1916  ;;  %v1912_v2 = vpop.permute.xlu0 %1911 }
 0xba5   :  { %v1919_v3 = vunpack.i.h.bf16 %v1917_v1  ;;  %v1918_v4 = vunpack.i.l.bf16 %v1917_v1  ;;  %v1914_v6 = vunpack.i.h.bf16 %v1912_v2  ;;  %v1913_v7 = vunpack.i.l.bf16 %v1912_v2  ;;  %1039 = vrot.lane.b32.xlu1 %v996_v63, %s2022_s27  ;;  %1041 = vrot.lane.b32.xlu0 %v997_v0, %s2022_s27 }
 0xba7   :  { %v994_v8 = vpack.c.bf16 %v1919_v3, %v1918_v4  ;;  %v995_v9 = vpack.c.bf16 %v1914_v6, %v1913_v7  ;;  %v2395_v3 = vld [vmem:[%s2484_s2] ss:$0 sm:$0xff] }
 0xba9   :  { %1035 = vrot.lane.b32.xlu1 %v994_v8, %s2022_s27  ;;  %1037 = vrot.lane.b32.xlu0 %v995_v9, %s2022_s27  ;;  %v1658_v9 = vld [vmem:[%s2488_s10 + $0x78] sm:$0xff] }
 0xbad   :  { %1010 = vperm.xlu1 %1859, %v1631_v39   ;;  %1033 = vrot.lane.b32.xlu0 %v993_v43, %s2022_s27  ;;  %v1954_v39 = vld [vmem:[%s2489_s9 + $0x30] sm:$0xff]   ;;  %v1656_v43 = vld [vmem:[%s2488_s10 + $0x68] sm:$0xff] }
 0xbb1   :  { %1000 = vperm.xlu1 %1859, %v1629_v13   ;;  %1015 = vperm.xlu0 %1858, %v1632_v14   ;;  %v1655_v13 = vld [vmem:[%s2488_s10 + $0x60] sm:$0xff]  ;;  %v1646_v14 = vld [vmem:[%s2490_s12 + $0x58] sm:$0xff] }
 0xbb5   :  { %1132 = vperm.xlu1 %1859, %v1643_v15   ;;  %1005 = vperm.xlu0 %1858, %v1630_v16   ;;  %v1645_v15 = vld [vmem:[%s2490_s12 + $0x50] sm:$0xff]  ;;  %v1670_v16 = vld [vmem:[%s2490_s12 + $0x68] sm:$0xff] }
 0xbb9   :  { %1137 = vperm.xlu0 %1858, %v1644_v17   ;;  %v1669_v17 = vld [vmem:[%s2490_s12 + $0x60] sm:$0xff] }
 0xc17   :  { %v1042_v18 = vpop.permute.xlu0 %1041  ;;  %v1040_v20 = vpop.permute.xlu1 %1039 }
 0xc18   :  { %1802 = vmatprep.subr.bf16.mxu1 %v1042_v18 }
 0xc19   :  { %1803 = vmatpush3.bf16.msra.mxu1 %v1042_v18  ;;  %v1678_v18 = vld [vmem:[%s2492_s14 + $0x8] sm:$0xff] }
 0xc1a   :  { %1804 = vmatprep.subr.bf16.mxu1 %v1040_v20 }
 0xc1b   :  { %v1038_v21 = vpop.permute.xlu0 %1037  ;;  %v1036_v22 = vpop.permute.xlu1 %1035 }
 0xc1d   :  { %1805 = vmatpush3.bf16.msra.mxu1 %v1040_v20 }
 0xc1e   :  { %1806 = vmatprep.subr.bf16.mxu1 %v1038_v21 }
 0xc1f   :  { %v1034_v23 = vpop.permute.xlu0 %1033 }
 0xc21   :  { %1807 = vmatpush3.bf16.msra.mxu1 %v1038_v21 }
 0xc22   :  { %1808 = vmatprep.subr.bf16.mxu1 %v1036_v22 }
 0xc25   :  { %1809 = vmatpush3.bf16.msra.mxu1 %v1036_v22 }
 0xc26   :  { %1810 = vmatprep.subr.bf16.mxu1 %v1034_v23 }
 0xc28   :  { %v1011_v26 = vpop.permute.xlu1 %1010 }
 0xc29   :  { %1811 = vmatpush3.bf16.msra.mxu1 %v1034_v23 }
 0xc2c   :  { %1813 = vmatmul.mubr.msk.bf16.vlgmr.msra.gmra.mxu1 %vm306_vm7, %v1951_v24  ;;  %v1016_v32 = vpop.permute.xlu0 %1015  ;;  %v1001_v37 = vpop.permute.xlu1 %1000 }
 0xc30   :  { %v1006_v42 = vpop.permute.xlu0 %1005  ;;  %v1133_v57 = vpop.permute.xlu1 %1132 }
 0xc34   :  { %v1138_v62 = vpop.permute.xlu0 %1137 }
 0xcec   :  { %v1814_v27 = vpop.f32.mrf.mxu1 }
 0xced   :  { %v1097_v28 = vadd.f32 %v1814_v27, %v1011_v26 }
 0xcee   :  { %v1088_v29 = vpop.f32.mrf.mxu1 }
 0xcef   :  { %v1637_v31 = vmul.f32 -1.442695, %v1097_v28  ;;  %v1089_v41 = vadd.f32 %v1088_v29, %v1001_v37 }
 0xcf0   :  { %v1815_v33 = vpop.f32.mrf.mxu1 }
 0xcf1   :  { %1988 = vpow2.f32 %v1637_v31  ;;  %v1100_v34 = vadd.f32 %v1815_v33, %v1016_v32 }
 0xcf2   :  { %v1091_v38 = vpop.f32.mrf.mxu1 }
 0xcf3   :  { %v1638_v19 = vmul.f32 -1.442695, %v1100_v34  ;;  %v1092_v45 = vadd.f32 %v1091_v38, %v1006_v42  ;;  %v1955_v38 = vld [vmem:[%s2489_s9 + $0x38] sm:$0xff]  }
 0xcf5   :  { %1990 = vpow2.f32 %v1638_v19 }
 0xcf6   :  { %1992 = vtanh.f32 %v1089_v41 }
 0xcfe   :  { %v1989_v40 = vpop.eup %1988 }
 0xcff   :  { %v1111_v44 = vadd.f32 1.0, %v1989_v40  ;;  %v1956_v40 = vld [vmem:[%s2491_s11 + $0x30] sm:$0xff]  }
 0xd00   :  { %1838 = vmatprep.mubr.msk.bf16.mxu1 %vm417_vm8, %v1956_v40 }
 0xd01   :  { %1994 = vrcp.f32 %v1111_v44 }
 0xd02   :  { %v1991_v46 = vpop.eup %1990  ;;  %1996 = vtanh.f32 %v1092_v45 }
 0xd03   :  { %v1112_v47 = vadd.f32 1.0, %v1991_v46  ;;  %v1993_v49 = vpop.eup %1992 }
 0xd05   :  { %1998 = vrcp.f32 %v1112_v47 }
 0xd0e   :  { %v1995_v50 = vpop.eup %1994 }
 0xd0f   :  { %v1997_v51 = vpop.eup %1996  ;;  %v1117_v53 = vmul.f32 %v1995_v50, %v1993_v49 }
 0xd12   :  { %v1999_v52 = vpop.eup %1998 }
 0xd13   :  { %v1118_v54 = vmul.f32 %v1999_v52, %v1997_v51 }
 0xd15   :  { %v1129_v35 = vpack.c.bf16 %v1118_v54, %v1117_v53 }
 0xd17   :  { %1816 = vmatprep.subr.bf16.mxu0 %v1129_v35 }
 0xd18   :  { %1817 = vmatpush3.bf16.msra.mxu0 %v1129_v35 }
 0xd1b   :  { %1819 = vmatmul.mubr.msk.bf16.vlgmr.msra.gmra.mxu0 %vm417_vm8, %v1953_v55 }
 0xd1c   :  { %1832 = vmatprep.mubr.msk.bf16.mxu0 %vm306_vm7, %v1954_v39 }
 0xddb   :  { %v2384_v56 = vpop.f32.mrf.mxu0 }
 0xddd   :  { %v1200_v58 = vpop.f32.mrf.mxu0 }
 0xdde   :  { %v1201_v59 = vadd.f32 %v1200_v58, %v1133_v57 }
 0xddf   :  { %v2386_v60 = vpop.f32.mrf.mxu0 }
 0xde0   :  { %v1215_v61 = vadd.f32 %v1201_v59, %v2330_v48 }
 0xde1   :  { %v1203_v63 = vpop.f32.mrf.mxu0 }
 0xde2   :  { %v1204_v0 = vadd.f32 %v1203_v63, %v1138_v62  ;;  %v1217_v1 = vmul.f32 %v2128_v10, %v1215_v61 }
 0xde4   :  { %v1216_v2 = vadd.f32 %v1204_v0, %v2335_v30  ;;  %1233 = vrot.lane.b32.xlu1 %v1217_v1, %s2018_s22 }
 0xde6   :  { %v1218_v4 = vmul.f32 %v2395_v3, %v1216_v2 }
 0xde8   :  { %1235 = vrot.lane.b32.xlu0 %v1218_v4, %s2018_s22 }
 0xe56   :  { %v1234_v6 = vpop.permute.xlu1 %1233 }
 0xe57   :  { %1239 = vst.msk [vmem:[#allocation2] sm:$0xff] %vm220_vm6, %v1234_v6 }
 0xe5a   :  { %v1236_v48 = vpop.permute.xlu0 %1235 }
 0xe5b   :  { %1240 = vst.msk [vmem:[#allocation2 + $0x8] sm:$0xff] %vm220_vm6, %v1236_v48  ;;  %v1957_v48 = vld [vmem:[%s2491_s11 + $0x38] sm:$0xff]  }
 0xe5e   :  { %v1241_v10 = vld [vmem:[#allocation2] sm:$0xff] }
 0xe62   :  { %v1242_v7 = vld [vmem:[#allocation2 + $0x8] sm:$0xff] }
 0xe63   :  { %v1925_v30 = vpack.i.bf16 %v1242_v7, %v1241_v10  ;;  %v1269_v8 = vpack.c.bf16 %v1242_v7, %v1241_v10 }
 0xe65   :  { %1926 = vrot.lane.b32.xlu0 %v1925_v30, %s2023_s28  ;;  %1921 = vrot.lane.b32.xlu1 %v1925_v30, %s2502_s29 }
 0xe69   :  { %1936 = vrot.lane.b32.xlu0 %v1925_v30, %s2022_s27  ;;  %1931 = vrot.lane.b32.xlu1 %v1925_v30, %s2020_s25 }
 0xe6d   :  { %1291 = vperm.xlu0 %1858, %v1658_v9   ;;  %1286 = vperm.xlu1 %1859, %v1657_v11  }
 0xe71   :  { %1281 = vperm.xlu0 %1858, %v1656_v43   ;;  %1276 = vperm.xlu1 %1859, %v1655_v13  }
 0xe75   :  { %1147 = vperm.xlu0 %1858, %v1646_v14   ;;  %1142 = vperm.xlu1 %1859, %v1645_v15  }
 0xe79   :  { %1393 = vperm.xlu0 %1858, %v1670_v16   ;;  %1388 = vperm.xlu1 %1859, %v1669_v17  }
 0xe7d   :  { %1478 = vperm.xlu1 %1859, %v1678_v18  }
 0xed7   :  { %v1927_v20 = vpop.permute.xlu0 %1926  ;;  %v1922_v21 = vpop.permute.xlu1 %1921 }
 0xed8   :  { %v1929_v22 = vunpack.i.h.bf16 %v1927_v20  ;;  %v1928_v23 = vunpack.i.l.bf16 %v1927_v20  ;;  %v1924_v24 = vunpack.i.h.bf16 %v1922_v21  ;;  %v1923_v25 = vunpack.i.l.bf16 %v1922_v21 }
 0xeda   :  { %v1273_v26 = vpack.c.bf16 %v1924_v24, %v1923_v25  ;;  %v1272_v28 = vpack.c.bf16 %v1929_v22, %v1928_v23  ;;  %v1677_v22 = vld [vmem:[%s2493_s13 + $0x4] sm:$0xf]  ;;  %v788_v24 = vmul.f32 %v2395_v3, %v2305_v12 }
 0xedb   :  { %v1932_v27 = vpop.permute.xlu1 %1931  ;;  %v1937_v32 = vpop.permute.xlu0 %1936 }
 0xedc   :  { %v1934_v29 = vunpack.i.h.bf16 %v1932_v27  ;;  %v1933_v31 = vunpack.i.l.bf16 %v1932_v27  ;;  %1822 = vmatprep.subr.bf16.mxu0 %v1273_v26  ;;  %v1939_v33 = vunpack.i.h.bf16 %v1937_v32  ;;  %v1938_v34 = vunpack.i.l.bf16 %v1937_v32 }
 0xedd   :  { %1823 = vmatpush3.bf16.msra.mxu0 %v1273_v26  ;;  %v790_v25 = vrot.slane %v788_v24, 4 }
 0xede   :  { %1824 = vmatprep.subr.bf16.mxu0 %v1272_v28  ;;  %v1271_v19 = vpack.c.bf16 %v1934_v29, %v1933_v31  ;;  %v1270_v37 = vpack.c.bf16 %v1939_v33, %v1938_v34 }
 0xedf   :  { %v793_v26 = vsel %vm792_vm10, %v790_v25, 0.0 }
 0xee0   :  { %v794_v27 = vrot.slane %v793_v26, 4 }
 0xee1   :  { %1825 = vmatpush3.bf16.msra.mxu0 %v1272_v28 }
 0xee2   :  { %1826 = vmatprep.subr.bf16.mxu0 %v1271_v19  ;;  %v795_v32 = vadd.f32 %v794_v27, %v793_v26 }
 0xee5   :  { %1827 = vmatpush3.bf16.msra.mxu0 %v1271_v19 }
 0xee6   :  { %1828 = vmatprep.subr.bf16.mxu0 %v1270_v37 }
 0xee8   :  { %v1287_v41 = vpop.permute.xlu1 %1286  ;;  %v1292_v47 = vpop.permute.xlu0 %1291 }
 0xee9   :  { %1829 = vmatpush3.bf16.msra.mxu0 %v1270_v37 }
 0xeea   :  { %1830 = vmatprep.subr.bf16.mxu0 %v1269_v8 }
 0xeec   :  { %v1277_v52 = vpop.permute.xlu1 %1276  ;;  %v1282_v55 = vpop.permute.xlu0 %1281 }
 0xeed   :  { %1831 = vmatpush3.bf16.msra.mxu0 %v1269_v8 }
 0xef0   :  { %1833 = vmatmul.mubr.msk.bf16.vlgmr.msra.gmra.mxu0 %vm306_vm7, %v1955_v38  ;;  %v1143_v10 = vpop.permute.xlu1 %1142  ;;  %v1148_v7 = vpop.permute.xlu0 %1147 }
 0xef1   :  { %v1209_v43 = vadd.f32 %v2384_v56, %v1143_v10  ;;  %v1212_v15 = vadd.f32 %v2386_v60, %v1148_v7  ;;  %v1550_v56 = vld [vmem:[%s2494_s3] sm:$0x3] }
 0xef2   :  { %v1551_v60 = vmul.f32 %v2395_v3, %v1550_v56 }
 0xef4   :  { %v1389_v8 = vpop.permute.xlu1 %1388  ;;  %v1394_v13 = vpop.permute.xlu0 %1393  ;;  %v1553_v23 = vsel %vm1552_vm9, %v1551_v60, 0.0 }
 0xef5   :  { %1554 = vadd.xlane.f32.xlu0 %v1553_v23 }
 0xef8   :  { %v1479_v28 = vpop.permute.xlu1 %1478 }
 0xfb0   :  { %v1834_v42 = vpop.f32.mrf.mxu0 }
 0xfb1   :  { %v1353_v44 = vadd.f32 %v1834_v42, %v1287_v41  ;;  %v796_v41 = vrot.slane %v795_v32, 2 }
 0xfb2   :  { %v1344_v45 = vpop.f32.mrf.mxu0 }
 0xfb3   :  { %v1663_v46 = vmul.f32 -1.442695, %v1353_v44  ;;  %v1345_v35 = vadd.f32 %v1344_v45, %v1277_v52  ;;  %v797_v45 = vadd.f32 %v796_v41, %v795_v32 }
 0xfb4   :  { %v1835_v49 = vpop.f32.mrf.mxu0 }
 0xfb5   :  { %2000 = vpow2.f32 %v1663_v46  ;;  %v1356_v50 = vadd.f32 %v1835_v49, %v1292_v47  ;;  %v798_v47 = vrot.slane %v797_v45, 1 }
 0xfb6   :  { %v1347_v53 = vpop.f32.mrf.mxu0 }
 0xfb7   :  { %v1664_v51 = vmul.f32 -1.442695, %v1356_v50  ;;  %v1348_v58 = vadd.f32 %v1347_v53, %v1282_v55  ;;  %v799_v52 = vadd.f32 %v798_v47, %v797_v45 }
 0xfb9   :  { %2002 = vpow2.f32 %v1664_v51 }
 0xfba   :  { %2004 = vtanh.f32 %v1345_v35 }
 0xfc2   :  { %v2001_v54 = vpop.eup %2000 }
 0xfc3   :  { %v1367_v57 = vadd.f32 1.0, %v2001_v54 }
 0xfc5   :  { %2006 = vrcp.f32 %v1367_v57 }
 0xfc6   :  { %v2003_v59 = vpop.eup %2002  ;;  %2008 = vtanh.f32 %v1348_v58 }
 0xfc7   :  { %v1368_v61 = vadd.f32 1.0, %v2003_v59  ;;  %v2005_v62 = vpop.eup %2004 }
 0xfc9   :  { %2010 = vrcp.f32 %v1368_v61 }
 0xfd2   :  { %v2007_v63 = vpop.eup %2006 }
 0xfd3   :  { %v2009_v0 = vpop.eup %2008  ;;  %v1373_v2 = vmul.f32 %v2007_v63, %v2005_v62 }
 0xfd6   :  { %v2011_v1 = vpop.eup %2010 }
 0xfd7   :  { %v1374_v4 = vmul.f32 %v2011_v1, %v2009_v0  ;;  %v1555_v0 = vpop.xlane.xlu0 %1554  ;;  %v1561_v1 = vstv %s2496_s0 }
 0xfd9   :  { %v1385_v6 = vpack.c.bf16 %v1374_v4, %v1373_v2  ;;  %v1562_v2 = vmul.f32 %v1561_v1, %v1555_v0 }
 0xfdb   :  { %1836 = vmatprep.subr.bf16.mxu1 %v1385_v6 }
 0xfdc   :  { %1837 = vmatpush3.bf16.msra.mxu1 %v1385_v6 }
 0xfdd   :  { %1842 = vmatprep.subr.bf16.mxu1 %v2016_v5 }
 0xfdf   :  { %1839 = vmatmul.mubr.msk.bf16.vlgmr.msra.gmra.mxu1 %vm417_vm8, %v1957_v48 }
 0xfe0   :  { %1844 = vmatprep.mubr.msk.bf16.mxu1 %vm2017_vm0, %v2016_v5 }
0x109f   :  { %v1840_v30 = vpop.f32.mrf.mxu1 }
0x10a1   :  { %v1454_v9 = vpop.f32.mrf.mxu1 }
0x10a2   :  { %v1455_v11 = vadd.f32 %v1454_v9, %v1389_v8 }
0x10a3   :  { %v1841_v39 = vpop.f32.mrf.mxu1 }
0x10a4   :  { %v1467_v16 = vadd.f32 %v1455_v11, %v1209_v43 }
0x10a5   :  { %v1457_v14 = vpop.f32.mrf.mxu1 }
0x10a6   :  { %v1458_v17 = vadd.f32 %v1457_v14, %v1394_v13  ;;  %v1471_v20 = vmul.f32 %v2395_v3, %v1467_v16 }
0x10a8   :  { %v1468_v18 = vadd.f32 %v1458_v17, %v1212_v15 }
0x10aa   :  { %v1472_v5 = vmul.f32 %v2395_v3, %v1468_v18 }
0x10ac   :  { %v1475_v21 = vpack.c.bf16 %v1472_v5, %v1471_v20 }
0x10ae   :  { %1843 = vmatpush3.bf16.msra.mxu1 %v1475_v21 }
0x10b1   :  { %1845 = vmatmul.mubr.msk.bf16.vlgmr.msra.gmra.mxu1 %vm417_vm8, %v1677_v22 }
0x1171   :  { %v1518_v29 = vpop.f32.mrf.mxu1 }
0x1172   :  { %v1519_v31 = vadd.f32 %v1518_v29, %v1479_v28 }
0x1173   :  { %v1846_v33 = vpop.f32.mrf.mxu1 }
0x1174   :  { %v1524_v34 = vmul.f32 1.442695, %v1519_v31  ;;  %v1532_v19 = vmul.f32 %v2395_v3, %v1519_v31 }
0x1175   :  { %v1521_v37 = vpop.f32.mrf.mxu1 }
0x1176   :  { %2012 = vpow2.f32 %v1524_v34  ;;  %v1534_v38 = vrot.slane %v1532_v19, 4 }
0x1177   :  { %v1847_v40 = vpop.f32.mrf.mxu1 }
0x1178   :  { %v1536_v42 = vsel %vm792_vm10, %v1534_v38, 0.0 }
0x1179   :  { %v1537_v44 = vrot.slane %v1536_v42, 4 }
0x117b   :  { %v1538_v12 = vadd.f32 %v1537_v44, %v1536_v42 }
0x117d   :  { %v1539_v46 = vrot.slane %v1538_v12, 2 }
0x117f   :  { %v1540_v49 = vadd.f32 %v1539_v46, %v1538_v12 }
0x1181   :  { %v1541_v50 = vrot.slane %v1540_v49, 1 }
0x1183   :  { %v2013_v51 = vpop.eup %2012  ;;  %v1542_v53 = vadd.f32 %v1541_v50, %v1540_v49 }
0x1184   :  { %v1526_v54 = vmul.f32 %v2013_v51, %v2320_v36 }
0x1185   :  { %v1543_v35 = vadd.f32 %v1542_v53, %v799_v52 }
0x1186   :  { %v1528_v55 = vrot.slane %v1526_v54, 4 }
0x1187   :  { %v1556_v57 = vmul.f32 %v1550_v56, %v1543_v35 }
0x1188   :  { %v1530_v58 = vadd.f32 %v1528_v55, %v1519_v31 }
0x1189   :  { %v1557_v59 = vsel %vm1552_vm9, %v1556_v57, 0.0 }
0x118a   :  { %v1531_v61 = vmul.f32 %v2395_v3, %v1530_v58  ;;  %1558 = vadd.xlane.f32.xlu1 %v1557_v59 }
0x118c   :  { %v1545_v62 = vrot.slane %v1531_v61, 4 }
0x118e   :  { %v1547_v63 = vsel %vm88_vm1, %v2320_v36, %v1545_v62 }
0x118f   :  { %1549 = vst.msk [vmem:[%s2495_s15] sm:$0xff] %vm1548_vm11, %v1547_v63 }
0x1213   :  { %v1559_v4 = vpop.xlane.xlu1 %1558 }
0x1214   :  { %v1563_v6 = vadd.f32 %v1562_v2, %v1559_v4 }
0x1216   :  { %1565 = vst.msk [vmem:[%s2497_s16] sm:$0x3] %vm1564_vm12, %v1563_v6 }

</bundles_post_ra>
